<compile_context>
chip_gen: v6e
topology: v6e:2x2x1
jax: 0.10.0
libtpu: 0.0.40
codegen_flags: <defaults>
</compile_context>

<pallas_src>
import jax
import jax.numpy as jnp
import numpy as np
from jax.experimental import pallas as pl
from jax.experimental.pallas import tpu as pltpu


def irblock_kernel(x_ref, w1_ref, w2_ref,
                   bn0s_ref, bn0b_ref, bn1b_ref, bn2b_ref, alpha_ref,
                   sew1_ref, sew2_ref,
                   o_ref, pad_ref):
    Bt, H, W, C = x_ref.shape            # per-grid-step block: Bt batch elements
    HW = H * W
    M = Bt * HW
    a = alpha_ref[0]                     # (C,) broadcast of the shared PReLU slope

    # ---- bn0 (inference: scale/bias pre-folded) ---------------------------
    out0 = x_ref[...].astype(jnp.float32) * bn0s_ref[0] + bn0b_ref[0]   # (Bt,H,W,C)

    # ---- padded scratch: zero ONLY the halo strips each step --------------
    # (interior is fully overwritten before each conv; per-sample slabs in
    #  dim 0 mean taps never bleed across batch elements)
    zrow = jnp.zeros((Bt, 1, W + 2, C), jnp.float32)
    zcol = jnp.zeros((Bt, H + 2, 1, C), jnp.float32)
    pad_ref[:, 0:1, :, :] = zrow
    pad_ref[:, H + 1:H + 2, :, :] = zrow
    pad_ref[:, :, 0:1, :] = zcol
    pad_ref[:, :, W + 1:W + 2, :] = zcol

    pad_ref[:, 1:H + 1, 1:W + 1, :] = out0

    def conv3x3(w_ref):
        # im2col: ONE deep-K matmul on the MXU, bf16 inputs / f32 accumulate.
        # Each tap is cast to bf16 before the concat so the (M, 9C) patch
        # buffer is built directly in bf16.
        taps = [pad_ref[:, kh:kh + H, kw:kw + W, :]
                .reshape(M, C).astype(jnp.bfloat16)
                for kh in range(3) for kw in range(3)]
        patches = jnp.concatenate(taps, axis=-1)                 # (M, 9C) bf16
        return jnp.dot(patches, w_ref[...], preferred_element_type=jnp.float32)

    # ---- conv1 (bn1 scale pre-folded into w1) + bn1 bias + PReLU ----------
    h = conv3x3(w1_ref) + bn1b_ref[0]                            # (M, C)
    h = jnp.where(h >= 0.0, h, a * h)

    # ---- conv2 input: overwrite interior only (halo already zero) ---------
    pad_ref[:, 1:H + 1, 1:W + 1, :] = h.reshape(Bt, H, W, C)

    # ---- conv2 (bn2 scale pre-folded into w2) + bn2 bias ------------------
    out2 = (conv3x3(w2_ref) + bn2b_ref[0]).reshape(Bt, HW, C)    # (Bt, HW, C)

    # ---- SE: per-sample global avg pool -> FC -> ReLU -> FC -> sigmoid ----
    pooled = jnp.mean(out2, axis=1)                              # (Bt, C)
    y1 = jnp.maximum(
        jnp.dot(pooled, sew1_ref[...], preferred_element_type=jnp.float32), 0.0)
    y2 = jax.nn.sigmoid(
        jnp.dot(y1, sew2_ref[...], preferred_element_type=jnp.float32))  # (Bt, C)

    # ---- SE scale + residual add (re-read x: short live range) + PReLU ----
    resid = x_ref[...].astype(jnp.float32).reshape(Bt, HW, C)
    out = out2 * y2[:, None, :] + resid
    out = jnp.where(out >= 0.0, out, a * out)
    o_ref[...] = out.reshape(Bt, H, W, C).astype(o_ref.dtype)


def _choose_block_batch(B, H, W, target_rows=256):
    """Largest batch tile Bt (dividing B) giving >= target_rows im2col matmul
    rows, while keeping >= 2 grid steps when B >= 2 so v7x's two TensorCores
    both receive work under dimension_semantics=("parallel",)."""
    hw = H * W
    choice = 1
    for bt in range(1, B + 1):
        if B % bt != 0:
            continue
        if B >= 2 and B // bt < 2:
            break                      # never collapse the grid to one step
        choice = bt
        if bt * hw >= target_rows:
            break                      # MXU M dimension filled
    return choice


def irblock_forward(x_nchw, w1, w2, bn0s, bn0b, bn1s, bn1b, bn2s, bn2b,
                    alpha, sew1, sew2, block_batch=None):
    B, C, H, W = x_nchw.shape
    # Supported config only: stride=1, downsample=None, planes == inplanes.
    assert w1.shape == (3, 3, C, C) and w2.shape == (3, 3, C, C), "unsupported IRBlock config"
    assert C % 16 == 0, "SE reduction requires channels % 16 == 0"

    Bt = _choose_block_batch(B, H, W) if block_batch is None else block_batch
    assert B % Bt == 0, "block_batch must divide batch"

    x = jnp.transpose(x_nchw, (0, 2, 3, 1))           # NCHW -> NHWC

    # Fold bn1/bn2 scales into the conv output channels; reshape to the
    # im2col weight layout (kh*3 + kw major, input channel minor); cast to bf16.
    w1m = (w1 * bn1s[0][None, None, None, :]).reshape(9 * C, C).astype(jnp.bfloat16)
    w2m = (w2 * bn2s[0][None, None, None, :]).reshape(9 * C, C).astype(jnp.bfloat16)

    # Shared PReLU slope as a per-channel row vector (mathematically identical).
    alpha_row = jnp.broadcast_to(alpha.reshape(1, 1), (1, C)).astype(jnp.float32)
    R = sew1.shape[1]

    const = lambda b: (0, 0)
    grid_spec = pltpu.PrefetchScalarGridSpec(
        num_scalar_prefetch=0,
        grid=(B // Bt,),                               # Bt batch elements per step
        in_specs=[
            pl.BlockSpec((Bt, H, W, C), lambda b: (b, 0, 0, 0)),  # x
            pl.BlockSpec((9 * C, C), const),                      # w1 (im2col, bn1-scaled)
            pl.BlockSpec((9 * C, C), const),                      # w2 (im2col, bn2-scaled)
            pl.BlockSpec((1, C), const),                          # bn0 scale
            pl.BlockSpec((1, C), const),                          # bn0 bias
            pl.BlockSpec((1, C), const),                          # bn1 bias
            pl.BlockSpec((1, C), const),                          # bn2 bias
            pl.BlockSpec((1, C), const),                          # PReLU alpha row
            pl.BlockSpec((C, R), const),                          # SE fc1 (C -> C//16)
            pl.BlockSpec((R, C), const),                          # SE fc2 (C//16 -> C)
        ],
        out_specs=pl.BlockSpec((Bt, H, W, C), lambda b: (b, 0, 0, 0)),
        scratch_shapes=[pltpu.VMEM((Bt, H + 2, W + 2, C), jnp.float32)],
    )

    out_nhwc = pl.pallas_call(
        irblock_kernel,
        out_shape=jax.ShapeDtypeStruct((B, H, W, C), jnp.float32),
        grid_spec=grid_spec,
        compiler_params=pltpu.CompilerParams(
            dimension_semantics=("parallel",),          # batch steps -> both TCs on v7x
            vmem_limit_bytes=48 * 1024 * 1024,          # above v5e/v6e scoped defaults,
                                                        # below v7x's 64 MiB physical
        ),
    )(x, w1m, w2m, bn0s, bn0b, bn1b, bn2b, alpha_row, sew1, sew2)

    return jnp.transpose(out_nhwc, (0, 3, 1, 2))        # NHWC -> NCHW


def ref_forward(x_nchw, w1, w2, bn0s, bn0b, bn1s, bn1b, bn2s, bn2b,
                alpha, sew1, sew2):
    """Pure-JAX f32 reference of the IRBlock forward (inference-mode BN)."""
    x = jnp.transpose(x_nchw, (0, 2, 3, 1))
    a = alpha[0]
    dn = ('NHWC', 'HWIO', 'NHWC')
    out = x * bn0s[0] + bn0b[0]
    out = jax.lax.conv_general_dilated(out, w1, (1, 1), 'SAME', dimension_numbers=dn)
    out = out * bn1s[0] + bn1b[0]
    out = jnp.where(out >= 0, out, a * out)
    out = jax.lax.conv_general_dilated(out, w2, (1, 1), 'SAME', dimension_numbers=dn)
    out = out * bn2s[0] + bn2b[0]
    pooled = jnp.mean(out, axis=(1, 2))
    y = jnp.maximum(pooled @ sew1, 0.0)
    y = jax.nn.sigmoid(y @ sew2)
    out = out * y[:, None, None, :]
    out = out + x
    out = jnp.where(out >= 0, out, a * out)
    return jnp.transpose(out, (0, 3, 1, 2))


def make_bn_params(key, c, eps=1e-5):
    k1, k2, k3, k4 = jax.random.split(key, 4)
    gamma = 1.0 + 0.1 * jax.random.normal(k1, (c,), jnp.float32)
    beta = 0.1 * jax.random.normal(k2, (c,), jnp.float32)
    mean = 0.1 * jax.random.normal(k3, (c,), jnp.float32)
    var = jnp.abs(jax.random.normal(k4, (c,), jnp.float32)) + 0.5
    scale = gamma / jnp.sqrt(var + eps)
    bias = beta - mean * scale
    return scale.reshape(1, c), bias.reshape(1, c)


if __name__ == "__main__":
    # inplanes = planes = 32 so that SE's channel // 16 >= 1 and the residual
    # add works with downsample=None, stride=1 (the module's default config).
    # B=4 so the batch tiler picks Bt=2 (M = 2*8*8 = 128 matmul rows) while the
    # grid still has 2 steps for the two-TensorCore "parallel" split.
    B, C, H, W = 4, 32, 8, 8
    R = C // 16

    key = jax.random.PRNGKey(0)
    keys = jax.random.split(key, 8)

    x_nchw = jax.random.normal(keys[0], (B, C, H, W), jnp.float32)

    w1 = 0.1 * jax.random.normal(keys[1], (3, 3, C, C), jnp.float32)   # HWIO
    w2 = 0.1 * jax.random.normal(keys[2], (3, 3, C, C), jnp.float32)   # HWIO
    bn0s, bn0b = make_bn_params(keys[3], C)
    bn1s, bn1b = make_bn_params(keys[4], C)
    bn2s, bn2b = make_bn_params(keys[5], C)
    sew1 = 0.1 * jax.random.normal(keys[6], (C, R), jnp.float32)       # Linear1 (pre-transposed)
    sew2 = 0.1 * jax.random.normal(keys[7], (R, C), jnp.float32)       # Linear2 (pre-transposed)
    alpha = jnp.array([0.25], jnp.float32)                             # nn.PReLU() default init

    args = (x_nchw, w1, w2, bn0s, bn0b, bn1s, bn1b, bn2s, bn2b, alpha, sew1, sew2)

    out = irblock_forward(*args)
    out = jax.block_until_ready(out)

    ref = ref_forward(*args)
    # bf16 MXU inputs (f32 accumulation) -> loosen tolerance vs the pure-f32 reference.
    np.testing.assert_allclose(np.asarray(out), np.asarray(ref), rtol=3e-2, atol=3e-2)

    print("KERNEL_OK")
</pallas_src>

<mosaic_0001>
module attributes {stable_mosaic.version = 11 : i64} {
  func.func @irblock_kernel(%arg0: i32, %arg1: memref<2x8x8x32xf32, #tpu.memory_space<vmem>>, %arg2: memref<288x32xbf16, #tpu.memory_space<vmem>>, %arg3: memref<288x32xbf16, #tpu.memory_space<vmem>>, %arg4: memref<1x32xf32, #tpu.memory_space<vmem>>, %arg5: memref<1x32xf32, #tpu.memory_space<vmem>>, %arg6: memref<1x32xf32, #tpu.memory_space<vmem>>, %arg7: memref<1x32xf32, #tpu.memory_space<vmem>>, %arg8: memref<1x32xf32, #tpu.memory_space<vmem>>, %arg9: memref<32x2xf32, #tpu.memory_space<vmem>>, %arg10: memref<2x32xf32, #tpu.memory_space<vmem>>, %arg11: memref<2x8x8x32xf32, #tpu.memory_space<vmem>>, %arg12: memref<2x10x10x32xf32, #tpu.memory_space<vmem>>) attributes {dimension_semantics = [#tpu.dimension_semantics<parallel>], iteration_bounds = array<i64: 2>, scalar_prefetch = 0 : i64, scratch_operands = 1 : i64, tpu.core_type = #tpu.core_type<tc>, window_params = [{transform_indices = @transform_0, window_bounds = array<i64: 2, 8, 8, 32>}, {pipeline_mode = #tpu.pipeline_mode<synchronous>, transform_indices = @transform_1, window_bounds = array<i64: 288, 32>}, {pipeline_mode = #tpu.pipeline_mode<synchronous>, transform_indices = @transform_2, window_bounds = array<i64: 288, 32>}, {pipeline_mode = #tpu.pipeline_mode<synchronous>, transform_indices = @transform_3, window_bounds = array<i64: 1, 32>}, {pipeline_mode = #tpu.pipeline_mode<synchronous>, transform_indices = @transform_4, window_bounds = array<i64: 1, 32>}, {pipeline_mode = #tpu.pipeline_mode<synchronous>, transform_indices = @transform_5, window_bounds = array<i64: 1, 32>}, {pipeline_mode = #tpu.pipeline_mode<synchronous>, transform_indices = @transform_6, window_bounds = array<i64: 1, 32>}, {pipeline_mode = #tpu.pipeline_mode<synchronous>, transform_indices = @transform_7, window_bounds = array<i64: 1, 32>}, {pipeline_mode = #tpu.pipeline_mode<synchronous>, transform_indices = @transform_8, window_bounds = array<i64: 32, 2>}, {pipeline_mode = #tpu.pipeline_mode<synchronous>, transform_indices = @transform_9, window_bounds = array<i64: 2, 32>}, {transform_indices = @transform_10, window_bounds = array<i64: 2, 8, 8, 32>}]} {
    %c0 = arith.constant 0 : index
    %c0_0 = arith.constant 0 : index
    %0 = vector.load %arg8[%c0, %c0_0] : memref<1x32xf32, #tpu.memory_space<vmem>>, vector<1x32xf32>
    %1 = vector.shape_cast %0 : vector<1x32xf32> to vector<32xf32>
    %c0_1 = arith.constant 0 : index
    %c0_2 = arith.constant 0 : index
    %c0_3 = arith.constant 0 : index
    %c0_4 = arith.constant 0 : index
    %2 = vector.load %arg1[%c0_1, %c0_2, %c0_3, %c0_4] : memref<2x8x8x32xf32, #tpu.memory_space<vmem>>, vector<2x8x8x32xf32>
    %c0_5 = arith.constant 0 : index
    %c0_6 = arith.constant 0 : index
    %3 = vector.load %arg4[%c0_5, %c0_6] : memref<1x32xf32, #tpu.memory_space<vmem>>, vector<1x32xf32>
    %4 = vector.shape_cast %3 : vector<1x32xf32> to vector<32xf32>
    %5 = vector.shape_cast %4 : vector<32xf32> to vector<1x1x1x32xf32>
    %6 = vector.broadcast %5 : vector<1x1x1x32xf32> to vector<2x8x8x32xf32>
    %7 = arith.mulf %2, %6 : vector<2x8x8x32xf32>
    %c0_7 = arith.constant 0 : index
    %c0_8 = arith.constant 0 : index
    %8 = vector.load %arg5[%c0_7, %c0_8] : memref<1x32xf32, #tpu.memory_space<vmem>>, vector<1x32xf32>
    %9 = vector.shape_cast %8 : vector<1x32xf32> to vector<32xf32>
    %10 = vector.shape_cast %9 : vector<32xf32> to vector<1x1x1x32xf32>
    %11 = vector.broadcast %10 : vector<1x1x1x32xf32> to vector<2x8x8x32xf32>
    %12 = arith.addf %7, %11 : vector<2x8x8x32xf32>
    %cst = arith.constant 0.000000e+00 : f32
    %13 = vector.broadcast %cst : f32 to vector<2x1x10x32xf32>
    %cst_9 = arith.constant 0.000000e+00 : f32
    %14 = vector.broadcast %cst_9 : f32 to vector<2x10x1x32xf32>
    %c0_10 = arith.constant 0 : index
    %c0_11 = arith.constant 0 : index
    %c0_12 = arith.constant 0 : index
    %c0_13 = arith.constant 0 : index
    %15 = vector.load %arg12[%c0_10, %c0_11, %c0_12, %c0_13] : memref<2x10x10x32xf32, #tpu.memory_space<vmem>>, vector<2x1x10x32xf32>
    tpu.vector_store %arg12[%c0_10, %c0_11, %c0_12, %c0_13], %13 {strides = array<i32>} : memref<2x10x10x32xf32, #tpu.memory_space<vmem>>, vector<2x1x10x32xf32>,
    %c0_14 = arith.constant 0 : index
    %c9 = arith.constant 9 : index
    %c0_15 = arith.constant 0 : index
    %c0_16 = arith.constant 0 : index
    %16 = vector.load %arg12[%c0_14, %c9, %c0_15, %c0_16] : memref<2x10x10x32xf32, #tpu.memory_space<vmem>>, vector<2x1x10x32xf32>
    tpu.vector_store %arg12[%c0_14, %c9, %c0_15, %c0_16], %13 {strides = array<i32>} : memref<2x10x10x32xf32, #tpu.memory_space<vmem>>, vector<2x1x10x32xf32>,
    %c0_17 = arith.constant 0 : index
    %c0_18 = arith.constant 0 : index
    %c0_19 = arith.constant 0 : index
    %c0_20 = arith.constant 0 : index
    %17 = vector.load %arg12[%c0_17, %c0_18, %c0_19, %c0_20] : memref<2x10x10x32xf32, #tpu.memory_space<vmem>>, vector<2x10x1x32xf32>
    tpu.vector_store %arg12[%c0_17, %c0_18, %c0_19, %c0_20], %14 {strides = array<i32>} : memref<2x10x10x32xf32, #tpu.memory_space<vmem>>, vector<2x10x1x32xf32>,
    %c0_21 = arith.constant 0 : index
    %c0_22 = arith.constant 0 : index
    %c9_23 = arith.constant 9 : index
    %c0_24 = arith.constant 0 : index
    %18 = vector.load %arg12[%c0_21, %c0_22, %c9_23, %c0_24] : memref<2x10x10x32xf32, #tpu.memory_space<vmem>>, vector<2x10x1x32xf32>
    tpu.vector_store %arg12[%c0_21, %c0_22, %c9_23, %c0_24], %14 {strides = array<i32>} : memref<2x10x10x32xf32, #tpu.memory_space<vmem>>, vector<2x10x1x32xf32>,
    %c0_25 = arith.constant 0 : index
    %c1 = arith.constant 1 : index
    %c1_26 = arith.constant 1 : index
    %c0_27 = arith.constant 0 : index
    %19 = vector.load %arg12[%c0_25, %c1, %c1_26, %c0_27] : memref<2x10x10x32xf32, #tpu.memory_space<vmem>>, vector<2x8x8x32xf32>
    tpu.vector_store %arg12[%c0_25, %c1, %c1_26, %c0_27], %12 {strides = array<i32>} : memref<2x10x10x32xf32, #tpu.memory_space<vmem>>, vector<2x8x8x32xf32>,
    %c0_28 = arith.constant 0 : index
    %c0_29 = arith.constant 0 : index
    %c0_30 = arith.constant 0 : index
    %c0_31 = arith.constant 0 : index
    %20 = vector.load %arg12[%c0_28, %c0_29, %c0_30, %c0_31] : memref<2x10x10x32xf32, #tpu.memory_space<vmem>>, vector<2x8x8x32xf32>
    %21 = vector.shape_cast %20 : vector<2x8x8x32xf32> to vector<128x32xf32>
    %22 = arith.truncf %21 : vector<128x32xf32> to vector<128x32xbf16>
    %c0_32 = arith.constant 0 : index
    %c0_33 = arith.constant 0 : index
    %c1_34 = arith.constant 1 : index
    %c0_35 = arith.constant 0 : index
    %23 = vector.load %arg12[%c0_32, %c0_33, %c1_34, %c0_35] : memref<2x10x10x32xf32, #tpu.memory_space<vmem>>, vector<2x8x8x32xf32>
    %24 = vector.shape_cast %23 : vector<2x8x8x32xf32> to vector<128x32xf32>
    %25 = arith.truncf %24 : vector<128x32xf32> to vector<128x32xbf16>
    %c0_36 = arith.constant 0 : index
    %c0_37 = arith.constant 0 : index
    %c2 = arith.constant 2 : index
    %c0_38 = arith.constant 0 : index
    %26 = vector.load %arg12[%c0_36, %c0_37, %c2, %c0_38] : memref<2x10x10x32xf32, #tpu.memory_space<vmem>>, vector<2x8x8x32xf32>
    %27 = vector.shape_cast %26 : vector<2x8x8x32xf32> to vector<128x32xf32>
    %28 = arith.truncf %27 : vector<128x32xf32> to vector<128x32xbf16>
    %c0_39 = arith.constant 0 : index
    %c1_40 = arith.constant 1 : index
    %c0_41 = arith.constant 0 : index
    %c0_42 = arith.constant 0 : index
    %29 = vector.load %arg12[%c0_39, %c1_40, %c0_41, %c0_42] : memref<2x10x10x32xf32, #tpu.memory_space<vmem>>, vector<2x8x8x32xf32>
    %30 = vector.shape_cast %29 : vector<2x8x8x32xf32> to vector<128x32xf32>
    %31 = arith.truncf %30 : vector<128x32xf32> to vector<128x32xbf16>
    %c0_43 = arith.constant 0 : index
    %c1_44 = arith.constant 1 : index
    %c1_45 = arith.constant 1 : index
    %c0_46 = arith.constant 0 : index
    %32 = vector.load %arg12[%c0_43, %c1_44, %c1_45, %c0_46] : memref<2x10x10x32xf32, #tpu.memory_space<vmem>>, vector<2x8x8x32xf32>
    %33 = vector.shape_cast %32 : vector<2x8x8x32xf32> to vector<128x32xf32>
    %34 = arith.truncf %33 : vector<128x32xf32> to vector<128x32xbf16>
    %c0_47 = arith.constant 0 : index
    %c1_48 = arith.constant 1 : index
    %c2_49 = arith.constant 2 : index
    %c0_50 = arith.constant 0 : index
    %35 = vector.load %arg12[%c0_47, %c1_48, %c2_49, %c0_50] : memref<2x10x10x32xf32, #tpu.memory_space<vmem>>, vector<2x8x8x32xf32>
    %36 = vector.shape_cast %35 : vector<2x8x8x32xf32> to vector<128x32xf32>
    %37 = arith.truncf %36 : vector<128x32xf32> to vector<128x32xbf16>
    %c0_51 = arith.constant 0 : index
    %c2_52 = arith.constant 2 : index
    %c0_53 = arith.constant 0 : index
    %c0_54 = arith.constant 0 : index
    %38 = vector.load %arg12[%c0_51, %c2_52, %c0_53, %c0_54] : memref<2x10x10x32xf32, #tpu.memory_space<vmem>>, vector<2x8x8x32xf32>
    %39 = vector.shape_cast %38 : vector<2x8x8x32xf32> to vector<128x32xf32>
    %40 = arith.truncf %39 : vector<128x32xf32> to vector<128x32xbf16>
    %c0_55 = arith.constant 0 : index
    %c2_56 = arith.constant 2 : index
    %c1_57 = arith.constant 1 : index
    %c0_58 = arith.constant 0 : index
    %41 = vector.load %arg12[%c0_55, %c2_56, %c1_57, %c0_58] : memref<2x10x10x32xf32, #tpu.memory_space<vmem>>, vector<2x8x8x32xf32>
    %42 = vector.shape_cast %41 : vector<2x8x8x32xf32> to vector<128x32xf32>
    %43 = arith.truncf %42 : vector<128x32xf32> to vector<128x32xbf16>
    %c0_59 = arith.constant 0 : index
    %c2_60 = arith.constant 2 : index
    %c2_61 = arith.constant 2 : index
    %c0_62 = arith.constant 0 : index
    %44 = vector.load %arg12[%c0_59, %c2_60, %c2_61, %c0_62] : memref<2x10x10x32xf32, #tpu.memory_space<vmem>>, vector<2x8x8x32xf32>
    %45 = vector.shape_cast %44 : vector<2x8x8x32xf32> to vector<128x32xf32>
    %46 = arith.truncf %45 : vector<128x32xf32> to vector<128x32xbf16>
    %47 = tpu.concatenate %22, %25, %28, %31, %34, %37, %40, %43, %46 in 1 : vector<128x32xbf16>, vector<128x32xbf16>, vector<128x32xbf16>, vector<128x32xbf16>, vector<128x32xbf16>, vector<128x32xbf16>, vector<128x32xbf16>, vector<128x32xbf16>, vector<128x32xbf16> -> vector<128x288xbf16>
    %c0_63 = arith.constant 0 : index
    %c0_64 = arith.constant 0 : index
    %48 = vector.load %arg2[%c0_63, %c0_64] : memref<288x32xbf16, #tpu.memory_space<vmem>>, vector<288x32xbf16>
    %cst_65 = arith.constant dense<0.000000e+00> : vector<128x32xf32>
    %49 = tpu.matmul %47, %48, %cst_65 {dimension_numbers = #tpu.dot_dimension_numbers<[1], [0], [0], [1], [0, 0, 1, 1], [], []>} : vector<128x288xbf16>, vector<288x32xbf16>, vector<128x32xf32> -> vector<128x32xf32>
    %c0_66 = arith.constant 0 : index
    %c0_67 = arith.constant 0 : index
    %50 = vector.load %arg6[%c0_66, %c0_67] : memref<1x32xf32, #tpu.memory_space<vmem>>, vector<1x32xf32>
    %51 = vector.shape_cast %50 : vector<1x32xf32> to vector<32xf32>
    %52 = vector.shape_cast %51 : vector<32xf32> to vector<1x32xf32>
    %53 = vector.broadcast %52 : vector<1x32xf32> to vector<128x32xf32>
    %54 = arith.addf %49, %53 : vector<128x32xf32>
    %cst_68 = arith.constant 0.000000e+00 : f32
    %55 = vector.broadcast %cst_68 : f32 to vector<128x32xf32>
    %56 = arith.cmpf oge, %54, %55 : vector<128x32xf32>
    %57 = vector.shape_cast %1 : vector<32xf32> to vector<1x32xf32>
    %58 = vector.broadcast %57 : vector<1x32xf32> to vector<128x32xf32>
    %59 = arith.mulf %58, %54 : vector<128x32xf32>
    %60 = arith.select %56, %54, %59 : vector<128x32xi1>, vector<128x32xf32>
    %61 = vector.shape_cast %60 : vector<128x32xf32> to vector<2x8x8x32xf32>
    %c0_69 = arith.constant 0 : index
    %c1_70 = arith.constant 1 : index
    %c1_71 = arith.constant 1 : index
    %c0_72 = arith.constant 0 : index
    %62 = vector.load %arg12[%c0_69, %c1_70, %c1_71, %c0_72] : memref<2x10x10x32xf32, #tpu.memory_space<vmem>>, vector<2x8x8x32xf32>
    tpu.vector_store %arg12[%c0_69, %c1_70, %c1_71, %c0_72], %61 {strides = array<i32>} : memref<2x10x10x32xf32, #tpu.memory_space<vmem>>, vector<2x8x8x32xf32>,
    %c0_73 = arith.constant 0 : index
    %c0_74 = arith.constant 0 : index
    %c0_75 = arith.constant 0 : index
    %c0_76 = arith.constant 0 : index
    %63 = vector.load %arg12[%c0_73, %c0_74, %c0_75, %c0_76] : memref<2x10x10x32xf32, #tpu.memory_space<vmem>>, vector<2x8x8x32xf32>
    %64 = vector.shape_cast %63 : vector<2x8x8x32xf32> to vector<128x32xf32>
    %65 = arith.truncf %64 : vector<128x32xf32> to vector<128x32xbf16>
    %c0_77 = arith.constant 0 : index
    %c0_78 = arith.constant 0 : index
    %c1_79 = arith.constant 1 : index
    %c0_80 = arith.constant 0 : index
    %66 = vector.load %arg12[%c0_77, %c0_78, %c1_79, %c0_80] : memref<2x10x10x32xf32, #tpu.memory_space<vmem>>, vector<2x8x8x32xf32>
    %67 = vector.shape_cast %66 : vector<2x8x8x32xf32> to vector<128x32xf32>
    %68 = arith.truncf %67 : vector<128x32xf32> to vector<128x32xbf16>
    %c0_81 = arith.constant 0 : index
    %c0_82 = arith.constant 0 : index
    %c2_83 = arith.constant 2 : index
    %c0_84 = arith.constant 0 : index
    %69 = vector.load %arg12[%c0_81, %c0_82, %c2_83, %c0_84] : memref<2x10x10x32xf32, #tpu.memory_space<vmem>>, vector<2x8x8x32xf32>
    %70 = vector.shape_cast %69 : vector<2x8x8x32xf32> to vector<128x32xf32>
    %71 = arith.truncf %70 : vector<128x32xf32> to vector<128x32xbf16>
    %c0_85 = arith.constant 0 : index
    %c1_86 = arith.constant 1 : index
    %c0_87 = arith.constant 0 : index
    %c0_88 = arith.constant 0 : index
    %72 = vector.load %arg12[%c0_85, %c1_86, %c0_87, %c0_88] : memref<2x10x10x32xf32, #tpu.memory_space<vmem>>, vector<2x8x8x32xf32>
    %73 = vector.shape_cast %72 : vector<2x8x8x32xf32> to vector<128x32xf32>
    %74 = arith.truncf %73 : vector<128x32xf32> to vector<128x32xbf16>
    %c0_89 = arith.constant 0 : index
    %c1_90 = arith.constant 1 : index
    %c1_91 = arith.constant 1 : index
    %c0_92 = arith.constant 0 : index
    %75 = vector.load %arg12[%c0_89, %c1_90, %c1_91, %c0_92] : memref<2x10x10x32xf32, #tpu.memory_space<vmem>>, vector<2x8x8x32xf32>
    %76 = vector.shape_cast %75 : vector<2x8x8x32xf32> to vector<128x32xf32>
    %77 = arith.truncf %76 : vector<128x32xf32> to vector<128x32xbf16>
    %c0_93 = arith.constant 0 : index
    %c1_94 = arith.constant 1 : index
    %c2_95 = arith.constant 2 : index
    %c0_96 = arith.constant 0 : index
    %78 = vector.load %arg12[%c0_93, %c1_94, %c2_95, %c0_96] : memref<2x10x10x32xf32, #tpu.memory_space<vmem>>, vector<2x8x8x32xf32>
    %79 = vector.shape_cast %78 : vector<2x8x8x32xf32> to vector<128x32xf32>
    %80 = arith.truncf %79 : vector<128x32xf32> to vector<128x32xbf16>
    %c0_97 = arith.constant 0 : index
    %c2_98 = arith.constant 2 : index
    %c0_99 = arith.constant 0 : index
    %c0_100 = arith.constant 0 : index
    %81 = vector.load %arg12[%c0_97, %c2_98, %c0_99, %c0_100] : memref<2x10x10x32xf32, #tpu.memory_space<vmem>>, vector<2x8x8x32xf32>
    %82 = vector.shape_cast %81 : vector<2x8x8x32xf32> to vector<128x32xf32>
    %83 = arith.truncf %82 : vector<128x32xf32> to vector<128x32xbf16>
    %c0_101 = arith.constant 0 : index
    %c2_102 = arith.constant 2 : index
    %c1_103 = arith.constant 1 : index
    %c0_104 = arith.constant 0 : index
    %84 = vector.load %arg12[%c0_101, %c2_102, %c1_103, %c0_104] : memref<2x10x10x32xf32, #tpu.memory_space<vmem>>, vector<2x8x8x32xf32>
    %85 = vector.shape_cast %84 : vector<2x8x8x32xf32> to vector<128x32xf32>
    %86 = arith.truncf %85 : vector<128x32xf32> to vector<128x32xbf16>
    %c0_105 = arith.constant 0 : index
    %c2_106 = arith.constant 2 : index
    %c2_107 = arith.constant 2 : index
    %c0_108 = arith.constant 0 : index
    %87 = vector.load %arg12[%c0_105, %c2_106, %c2_107, %c0_108] : memref<2x10x10x32xf32, #tpu.memory_space<vmem>>, vector<2x8x8x32xf32>
    %88 = vector.shape_cast %87 : vector<2x8x8x32xf32> to vector<128x32xf32>
    %89 = arith.truncf %88 : vector<128x32xf32> to vector<128x32xbf16>
    %90 = tpu.concatenate %65, %68, %71, %74, %77, %80, %83, %86, %89 in 1 : vector<128x32xbf16>, vector<128x32xbf16>, vector<128x32xbf16>, vector<128x32xbf16>, vector<128x32xbf16>, vector<128x32xbf16>, vector<128x32xbf16>, vector<128x32xbf16>, vector<128x32xbf16> -> vector<128x288xbf16>
    %c0_109 = arith.constant 0 : index
    %c0_110 = arith.constant 0 : index
    %91 = vector.load %arg3[%c0_109, %c0_110] : memref<288x32xbf16, #tpu.memory_space<vmem>>, vector<288x32xbf16>
    %cst_111 = arith.constant dense<0.000000e+00> : vector<128x32xf32>
    %92 = tpu.matmul %90, %91, %cst_111 {dimension_numbers = #tpu.dot_dimension_numbers<[1], [0], [0], [1], [0, 0, 1, 1], [], []>} : vector<128x288xbf16>, vector<288x32xbf16>, vector<128x32xf32> -> vector<128x32xf32>
    %c0_112 = arith.constant 0 : index
    %c0_113 = arith.constant 0 : index
    %93 = vector.load %arg7[%c0_112, %c0_113] : memref<1x32xf32, #tpu.memory_space<vmem>>, vector<1x32xf32>
    %94 = vector.shape_cast %93 : vector<1x32xf32> to vector<32xf32>
    %95 = vector.shape_cast %94 : vector<32xf32> to vector<1x32xf32>
    %96 = vector.broadcast %95 : vector<1x32xf32> to vector<128x32xf32>
    %97 = arith.addf %92, %96 : vector<128x32xf32>
    %98 = vector.shape_cast %97 : vector<128x32xf32> to vector<2x64x32xf32>
    %cst_114 = arith.constant dense<0.000000e+00> : vector<2x32xf32>
    %99 = vector.multi_reduction <add>, %98, %cst_114 [1] : vector<2x64x32xf32> to vector<2x32xf32>
    %cst_115 = arith.constant 6.400000e+01 : f32
    %100 = vector.broadcast %cst_115 : f32 to vector<2x32xf32>
    %101 = arith.divf %99, %100 : vector<2x32xf32>
    %c0_116 = arith.constant 0 : index
    %c0_117 = arith.constant 0 : index
    %102 = vector.load %arg9[%c0_116, %c0_117] : memref<32x2xf32, #tpu.memory_space<vmem>>, vector<32x2xf32>
    %cst_118 = arith.constant dense<0.000000e+00> : vector<2x2xf32>
    %103 = tpu.matmul %101, %102, %cst_118 {dimension_numbers = #tpu.dot_dimension_numbers<[1], [0], [0], [1], [0, 0, 1, 1], [], []>} : vector<2x32xf32>, vector<32x2xf32>, vector<2x2xf32> -> vector<2x2xf32>
    %cst_119 = arith.constant 0.000000e+00 : f32
    %104 = vector.broadcast %cst_119 : f32 to vector<2x2xf32>
    %105 = arith.maximumf %103, %104 : vector<2x2xf32>
    %c0_120 = arith.constant 0 : index
    %c0_121 = arith.constant 0 : index
    %106 = vector.load %arg10[%c0_120, %c0_121] : memref<2x32xf32, #tpu.memory_space<vmem>>, vector<2x32xf32>
    %cst_122 = arith.constant dense<0.000000e+00> : vector<2x32xf32>
    %107 = tpu.matmul %105, %106, %cst_122 {dimension_numbers = #tpu.dot_dimension_numbers<[1], [0], [0], [1], [0, 0, 1, 1], [], []>} : vector<2x2xf32>, vector<2x32xf32>, vector<2x32xf32> -> vector<2x32xf32>
    %108 = arith.negf %107 : vector<2x32xf32>
    %109 = math.exp %108 : vector<2x32xf32>
    %cst_123 = arith.constant 1.000000e+00 : f32
    %110 = vector.broadcast %cst_123 : f32 to vector<2x32xf32>
    %111 = arith.addf %110, %109 : vector<2x32xf32>
    %112 = arith.divf %110, %111 : vector<2x32xf32>
    %c0_124 = arith.constant 0 : index
    %c0_125 = arith.constant 0 : index
    %c0_126 = arith.constant 0 : index
    %c0_127 = arith.constant 0 : index
    %113 = vector.load %arg1[%c0_124, %c0_125, %c0_126, %c0_127] : memref<2x8x8x32xf32, #tpu.memory_space<vmem>>, vector<2x8x8x32xf32>
    %114 = vector.shape_cast %113 : vector<2x8x8x32xf32> to vector<2x64x32xf32>
    %115 = vector.shape_cast %112 : vector<2x32xf32> to vector<2x1x32xf32>
    %116 = vector.broadcast %115 : vector<2x1x32xf32> to vector<2x64x32xf32>
    %117 = arith.mulf %98, %116 : vector<2x64x32xf32>
    %118 = arith.addf %117, %114 : vector<2x64x32xf32>
    %cst_128 = arith.constant 0.000000e+00 : f32
    %119 = vector.broadcast %cst_128 : f32 to vector<2x64x32xf32>
    %120 = arith.cmpf oge, %118, %119 : vector<2x64x32xf32>
    %121 = vector.shape_cast %1 : vector<32xf32> to vector<1x1x32xf32>
    %122 = vector.broadcast %121 : vector<1x1x32xf32> to vector<2x64x32xf32>
    %123 = arith.mulf %122, %118 : vector<2x64x32xf32>
    %124 = arith.select %120, %118, %123 : vector<2x64x32xi1>, vector<2x64x32xf32>
    %125 = vector.shape_cast %124 : vector<2x64x32xf32> to vector<2x8x8x32xf32>
    %c0_129 = arith.constant 0 : index
    %c0_130 = arith.constant 0 : index
    %c0_131 = arith.constant 0 : index
    %c0_132 = arith.constant 0 : index
    %126 = vector.load %arg11[%c0_129, %c0_130, %c0_131, %c0_132] : memref<2x8x8x32xf32, #tpu.memory_space<vmem>>, vector<2x8x8x32xf32>
    tpu.vector_store %arg11[%c0_129, %c0_130, %c0_131, %c0_132], %125 {strides = array<i32>} : memref<2x8x8x32xf32, #tpu.memory_space<vmem>>, vector<2x8x8x32xf32>,
    return
  }
  func.func @transform_0(%arg0: i32) -> (i32, i32, i32, i32) {
    %c0_i32 = arith.constant 0 : i32
    %c0_i32_0 = arith.constant 0 : i32
    %c0_i32_1 = arith.constant 0 : i32
    %c0_i32_2 = arith.constant 0 : i32
    return %arg0, %c0_i32, %c0_i32_0, %c0_i32_1 : i32, i32, i32, i32
  }
  func.func @transform_1(%arg0: i32) -> (i32, i32) {
    %c0_i32 = arith.constant 0 : i32
    %c0_i32_0 = arith.constant 0 : i32
    %c0_i32_1 = arith.constant 0 : i32
    return %c0_i32, %c0_i32_0 : i32, i32
  }
  func.func @transform_2(%arg0: i32) -> (i32, i32) {
    %c0_i32 = arith.constant 0 : i32
    %c0_i32_0 = arith.constant 0 : i32
    %c0_i32_1 = arith.constant 0 : i32
    return %c0_i32, %c0_i32_0 : i32, i32
  }
  func.func @transform_3(%arg0: i32) -> (i32, i32) {
    %c0_i32 = arith.constant 0 : i32
    %c0_i32_0 = arith.constant 0 : i32
    %c0_i32_1 = arith.constant 0 : i32
    return %c0_i32, %c0_i32_0 : i32, i32
  }
  func.func @transform_4(%arg0: i32) -> (i32, i32) {
    %c0_i32 = arith.constant 0 : i32
    %c0_i32_0 = arith.constant 0 : i32
    %c0_i32_1 = arith.constant 0 : i32
    return %c0_i32, %c0_i32_0 : i32, i32
  }
  func.func @transform_5(%arg0: i32) -> (i32, i32) {
    %c0_i32 = arith.constant 0 : i32
    %c0_i32_0 = arith.constant 0 : i32
    %c0_i32_1 = arith.constant 0 : i32
    return %c0_i32, %c0_i32_0 : i32, i32
  }
  func.func @transform_6(%arg0: i32) -> (i32, i32) {
    %c0_i32 = arith.constant 0 : i32
    %c0_i32_0 = arith.constant 0 : i32
    %c0_i32_1 = arith.constant 0 : i32
    return %c0_i32, %c0_i32_0 : i32, i32
  }
  func.func @transform_7(%arg0: i32) -> (i32, i32) {
    %c0_i32 = arith.constant 0 : i32
    %c0_i32_0 = arith.constant 0 : i32
    %c0_i32_1 = arith.constant 0 : i32
    return %c0_i32, %c0_i32_0 : i32, i32
  }
  func.func @transform_8(%arg0: i32) -> (i32, i32) {
    %c0_i32 = arith.constant 0 : i32
    %c0_i32_0 = arith.constant 0 : i32
    %c0_i32_1 = arith.constant 0 : i32
    return %c0_i32, %c0_i32_0 : i32, i32
  }
  func.func @transform_9(%arg0: i32) -> (i32, i32) {
    %c0_i32 = arith.constant 0 : i32
    %c0_i32_0 = arith.constant 0 : i32
    %c0_i32_1 = arith.constant 0 : i32
    return %c0_i32, %c0_i32_0 : i32, i32
  }
  func.func @transform_10(%arg0: i32) -> (i32, i32, i32, i32) {
    %c0_i32 = arith.constant 0 : i32
    %c0_i32_0 = arith.constant 0 : i32
    %c0_i32_1 = arith.constant 0 : i32
    %c0_i32_2 = arith.constant 0 : i32
    return %arg0, %c0_i32, %c0_i32_0, %c0_i32_1 : i32, i32, i32, i32
  }
}

</mosaic_0001>

<bundles_post_ra>
// kernel: tpu_custom_call.1
= control target key start
LH: loop header
LB: loop body
LE: loop exit
PB: predicated region body
PF: predicated region fallthrough
CT: control target
= control target key end

     0   :  { %s4363_s0 = inlined_call_operand.vmem [shape: f32[4,8,8,32], index: 0, kind: input, shape index: {}]   ;;  %s4364_s1 = inlined_call_operand.vmem [shape: bf16[288,32], index: 1, kind: input, shape index: {}]   ;;  %s4365_s2 = inlined_call_operand.vmem [shape: bf16[288,32], index: 2, kind: input, shape index: {}]   ;;  %s4366_s3 = inlined_call_operand.vmem [shape: f32[1,32], index: 3, kind: input, shape index: {}]   ;;  %s4367_s4 = inlined_call_operand.vmem [shape: f32[1,32], index: 4, kind: input, shape index: {}]   ;;  %s4368_s5 = inlined_call_operand.vmem [shape: f32[1,32], index: 5, kind: input, shape index: {}]   ;;  %s4369_s6 = inlined_call_operand.vmem [shape: f32[1,32], index: 6, kind: input, shape index: {}]   ;;  %s4370_s7 = inlined_call_operand.vmem [shape: f32[1,32], index: 7, kind: input, shape index: {}]   ;;  %s4371_s8 = inlined_call_operand.vmem [shape: f32[32,2], index: 8, kind: input, shape index: {}]   ;;  %s4372_s9 = inlined_call_operand.vmem [shape: f32[2,32], index: 9, kind: input, shape index: {}]   ;;  %s4373_s10 = inlined_call_operand.hbm [shape: f32[4,8,8,32], index: 10, kind: output, shape index: {}]  }
   0x1   :  { %4379 = sst [smem:[#allocation6_spill]] %s4366_s3 }
   0x2   :  { %15 = vsyncpa [#allocation4], 0 }
   0x3   :  { %17 = vsyncpa [#allocation4 + $0x1], 0  ;;  %s3224_s13 = smov 0   ;;  %s3226_s14 = smov 0  }
   0x4   :  { %s3228_s15 = smov 0   ;;  %s3230_s16 = smov 0  }
   0x5 LB: > { %s3245_s17 = sadd.s32 4294967295, %s3158_s16   ;;  %s2717_s18 = sadd.s32 4294967294, %s3158_s16   ;;  %s3158_s16 = sphi %s3230_s16, %s4407_s16   ;;  %s3154_s15 = sphi %s3228_s15, %s4406_s15   ;;  %s3150_s14 = sphi %s3226_s14, %s4405_s14   ;;  %s3146_s13 = sphi %s3224_s13, %s4404_s13  }
   0x6   : > { %s3249_s19 = sadd.s32 1, %s3158_s16   ;;  %s245_s20 = sadd.s32 1, %s3154_s15 }
   0x7   : > { %s242_s21 = ssub.s32 %s3158_s16, %s3249_s19  ;;  %p255_p0 = scmp.ne.s32.totalorder %s3154_s15, %s3150_s14 }
   0x8   : > { %p243_p1 = scmp.eq.s32.totalorder %s242_s21, 0  ;;  %p256_p2 = scmp.eq.s32.totalorder %s3245_s17, 1 }
   0x9   : > { %p261_p3 = scmp.ne.s32.totalorder %s3150_s14, %s3146_s13  ;;  %p262_p4 = scmp.eq.s32.totalorder %s2717_s18, 1 }
   0xa   : > { %s3260_s22 = scalar_select %p243_p1, %s3154_s15, %s245_s20  }
   0xb   : > { %p3262_p5 = por %p256_p2, %p255_p0  ;;  %p3266_p6 = por %p262_p4, %p261_p3 }
   0xc   : > { %p2720_p7 = scmp.ge.s32.totalorder %s3158_s16, 1  ;;  %p317_p8 = scmp.lt.s32.totalorder %s3158_s16, 3 }
   0xe   : > { %p318_p9 = pnand %p2720_p7, %p317_p8 }
   0xf   : > { %s2722_s25 = sshll.u32 (!%p318_p9), %s3245_s17, 1  ;;  %s4383_s3 = sld [smem:[#allocation6_spill]] (!%p318_p9) }
  0x10   : > { %321 = sbr.rel (%p318_p9) target bundleno = 1316 (0x524), region = 60  ;;  %p3275_p10 = scmp.lt.s32.totalorder (!%p318_p9), %s2722_s25, 3 }
  0x11   : > { %s4376_s30 = smov (!%p318_p9), 64   ;;  %s4374_s12 = smov (!%p318_p9), 96  }
  0x12   : > { %s353_s26 = sand.u32 (!%p318_p9), 1, %s3150_s14   ;;  %s2794_s29 = sshll.u32 (!%p318_p9), %s3245_s17, 11 }
  0x15   : > { %vm4378_vm0 = vcmask 261120   ;;  %vm439_vm1 = vcmask 253952   ;;  %vm430_vm2 = vcmask 254976   ;;  %v3057_v0 = vld [vmem:[%s4364_s1 + $0x78] sm:$0xff]   ;;  %v3160_v1 = vmov 0.0   ;;  %s4409_s25 = smov (!%p3275_p10, %s2722_s25), 3 }
  0x16   : > { %442 = vst.msk [vmem:[#allocation2 + $0x20] sm:$0x1] %vm439_vm1, %v3160_v1  ;;  %443 = vst.msk [vmem:[#allocation2 + $0x30] sm:$0x1] %vm439_vm1, %v3160_v1  ;;  %v3369_v2 = vld [vmem:[%s4383_s3] ss:$0 sm:$0xff]  ;;  %2795 = vmatprep.subr.bf16.mxu0 %v3057_v0 }
  0x17   : > { %429 = vst.msk [vmem:[#allocation2] sm:$0xff] %vm4378_vm0, %v3160_v1  ;;  %432 = vst.msk [vmem:[#allocation2 + $0xa0] sm:$0xff] %vm4378_vm0, %v3160_v1  ;;  %v3058_v3 = vld [vmem:[%s4364_s1 + $0x38] sm:$0xff]   ;;  %v3059_v4 = vld [vmem:[%s4364_s1 + $0x70] sm:$0xff]   ;;  %s2792_s21 = sshll.u32 %s4409_s25, 6  ;;  %s3162_s25 = smov 32  }
  0x18   : > { %435 = vst.msk [vmem:[#allocation2 + $0x90] sm:$0xff] %vm4378_vm0, %v3160_v1  ;;  %437 = vst.msk [vmem:[#allocation2 + $0x130] sm:$0xff] %vm4378_vm0, %v3160_v1  ;;  %v3396_v5 = vld [vmem:[%s4367_s4] ss:$0 sm:$0xff]  ;;  %2796 = vmatpush3.bf16.msra.mxu0 %v3058_v3  ;;  %v3060_v6 = vld [vmem:[%s4364_s1 + $0x30] sm:$0xff]   ;;  %s3404_s11 = scalar_lea.vmem %s4363_s0, %s2792_s21  ;;  %vm882_vm3 = vcmask 523264   ;;  %s4284_s21 = scalar_lea.hbm %s4373_s10, %s2794_s29 }
  0x19   : > { %441 = vst.msk [vmem:[#allocation2 + $0x10] sm:$0x1] %vm439_vm1, %v3160_v1  ;;  %444 = vst.msk [vmem:[#allocation2 + $0x40] sm:$0x1] %vm439_vm1, %v3160_v1  ;;  %2797 = vmatprep.subr.bf16.mxu0 %v3059_v4  ;;  %v3061_v7 = vld [vmem:[%s4364_s1 + $0x68] sm:$0xff]   ;;  %v368_v9 = vld [vmem:[%s3404_s11 + $0x10] sm:$0xff] }
  0x1a   : > { %445 = vst.msk [vmem:[#allocation2 + $0x50] sm:$0x1] %vm439_vm1, %v3160_v1  ;;  %446 = vst.msk [vmem:[#allocation2 + $0x60] sm:$0x1] %vm439_vm1, %v3160_v1  ;;  %v367_v8 = vld [vmem:[%s3404_s11 + $0x8] sm:$0xff]  ;;  %v366_v10 = vld [vmem:[%s3404_s11] sm:$0xff]  ;;  %v391_v12 = vmul.f32 %v3369_v2, %v368_v9 }
  0x1b   : > { %447 = vst.msk [vmem:[#allocation2 + $0x70] sm:$0x1] %vm439_vm1, %v3160_v1  ;;  %448 = vst.msk [vmem:[#allocation2 + $0x80] sm:$0x1] %vm439_vm1, %v3160_v1  ;;  %v390_v11 = vmul.f32 %v3369_v2, %v367_v8  ;;  %v389_v13 = vmul.f32 %v3369_v2, %v366_v10  ;;  %v369_v14 = vld [vmem:[%s3404_s11 + $0x18] sm:$0xff]  ;;  %v370_v15 = vld [vmem:[%s3404_s11 + $0x20] sm:$0xff] }
  0x1c   : > { %451 = vst.msk [vmem:[#allocation2 + $0xb0] sm:$0x1] %vm439_vm1, %v3160_v1  ;;  %452 = vst.msk [vmem:[#allocation2 + $0xc0] sm:$0x1] %vm439_vm1, %v3160_v1  ;;  %v371_v16 = vld [vmem:[%s3404_s11 + $0x28] sm:$0xff]  ;;  %v392_v17 = vmul.f32 %v3369_v2, %v369_v14  ;;  %v393_v18 = vmul.f32 %v3369_v2, %v370_v15  ;;  %v372_v20 = vld [vmem:[%s3404_s11 + $0x30] sm:$0xff]  ;;  %2798 = vmatpush3.bf16.msra.mxu0 %v3060_v6  ;;  %v414_v23 = vadd.f32 %v3396_v5, %v391_v12 }
  0x1d   : > { %453 = vst.msk [vmem:[#allocation2 + $0xd0] sm:$0x1] %vm439_vm1, %v3160_v1  ;;  %454 = vst.msk [vmem:[#allocation2 + $0xe0] sm:$0x1] %vm439_vm1, %v3160_v1  ;;  %v394_v19 = vmul.f32 %v3369_v2, %v371_v16  ;;  %v373_v21 = vld [vmem:[%s3404_s11 + $0x38] sm:$0xff]  ;;  %v413_v22 = vadd.f32 %v3396_v5, %v390_v11  ;;  %v412_v24 = vadd.f32 %v3396_v5, %v389_v13  ;;  %2799 = vmatprep.subr.bf16.mxu0 %v3061_v7  ;;  %v374_v30 = vld [vmem:[%s3404_s11 + $0x40] sm:$0xff] }
  0x1e   : > { %455 = vst.msk [vmem:[#allocation2 + $0xf0] sm:$0x1] %vm439_vm1, %v3160_v1  ;;  %456 = vst.msk [vmem:[#allocation2 + $0x100] sm:$0x1] %vm439_vm1, %v3160_v1  ;;  %v395_v25 = vmul.f32 %v3369_v2, %v372_v20  ;;  %v415_v26 = vadd.f32 %v3396_v5, %v392_v17  ;;  %v416_v27 = vadd.f32 %v3396_v5, %v393_v18  ;;  %v375_v31 = vld [vmem:[%s3404_s11 + $0x48] sm:$0xff]  ;;  %v376_v35 = vld [vmem:[%s3404_s11 + $0x50] sm:$0xff] }
  0x1f   : > { %457 = vst.msk [vmem:[#allocation2 + $0x110] sm:$0x1] %vm439_vm1, %v3160_v1  ;;  %458 = vst.msk [vmem:[#allocation2 + $0x120] sm:$0x1] %vm439_vm1, %v3160_v1  ;;  %v417_v28 = vadd.f32 %v3396_v5, %v394_v19  ;;  %v396_v29 = vmul.f32 %v3369_v2, %v373_v21  ;;  %v397_v33 = vmul.f32 %v3369_v2, %v374_v30  ;;  %v377_v36 = vld [vmem:[%s3404_s11 + $0x58] sm:$0xff]  ;;  %v378_v40 = vld [vmem:[%s3404_s11 + $0x60] sm:$0xff] }
  0x20   : > { %461 = vst.msk [vmem:[#allocation2 + $0x19] sm:$0x1] %vm439_vm1, %v3160_v1  ;;  %462 = vst.msk [vmem:[#allocation2 + $0x29] sm:$0x1] %vm439_vm1, %v3160_v1  ;;  %v418_v32 = vadd.f32 %v3396_v5, %v395_v25  ;;  %v398_v34 = vmul.f32 %v3369_v2, %v375_v31  ;;  %v399_v38 = vmul.f32 %v3369_v2, %v376_v35  ;;  %v379_v41 = vld [vmem:[%s3404_s11 + $0x68] sm:$0xff]  ;;  %v380_v42 = vld [vmem:[%s3404_s11 + $0x70] sm:$0xff] }
  0x21   : > { %463 = vst.msk [vmem:[#allocation2 + $0x39] sm:$0x1] %vm439_vm1, %v3160_v1  ;;  %464 = vst.msk [vmem:[#allocation2 + $0x49] sm:$0x1] %vm439_vm1, %v3160_v1  ;;  %v419_v37 = vadd.f32 %v3396_v5, %v396_v29  ;;  %v400_v39 = vmul.f32 %v3369_v2, %v377_v36  ;;  %v420_v43 = vadd.f32 %v3396_v5, %v397_v33  ;;  %v381_v47 = vld [vmem:[%s3404_s11 + $0x78] sm:$0xff]  ;;  %v3062_v52 = vld [vmem:[%s4364_s1 + $0x28] sm:$0xff]  }
  0x22   : > { %465 = vst.msk [vmem:[#allocation2 + $0x59] sm:$0x1] %vm439_vm1, %v3160_v1  ;;  %466 = vst.msk [vmem:[#allocation2 + $0x69] sm:$0x1] %vm439_vm1, %v3160_v1  ;;  %v421_v44 = vadd.f32 %v3396_v5, %v398_v34  ;;  %v401_v45 = vmul.f32 %v3369_v2, %v378_v40  ;;  %v402_v46 = vmul.f32 %v3369_v2, %v379_v41  ;;  %v3063_v55 = vld [vmem:[%s4364_s1 + $0x60] sm:$0xff]   ;;  %2800 = vmatpush3.bf16.msra.mxu0 %v3062_v52  ;;  %v3065_v60 = vld [vmem:[%s4364_s1 + $0x58] sm:$0xff]  }
  0x23   : > { %467 = vst.msk [vmem:[#allocation2 + $0x79] sm:$0x1] %vm439_vm1, %v3160_v1  ;;  %468 = vst.msk [vmem:[#allocation2 + $0x89] sm:$0x1] %vm439_vm1, %v3160_v1  ;;  %v422_v48 = vadd.f32 %v3396_v5, %v399_v38  ;;  %v423_v49 = vadd.f32 %v3396_v5, %v400_v39  ;;  %v403_v50 = vmul.f32 %v3369_v2, %v380_v42  ;;  %v3064_v59 = vld [vmem:[%s4364_s1 + $0x20] sm:$0xff]   ;;  %2801 = vmatprep.subr.bf16.mxu0 %v3063_v55  ;;  %v3070_v30 = vld [vmem:[%s4364_s1 + $0x8] sm:$0xff]  }
  0x24   : > { %471 = vst.msk [vmem:[#allocation2 + $0xb9] sm:$0x1] %vm439_vm1, %v3160_v1  ;;  %472 = vst.msk [vmem:[#allocation2 + $0xc9] sm:$0x1] %vm439_vm1, %v3160_v1  ;;  %v404_v51 = vmul.f32 %v3369_v2, %v381_v47  ;;  %v424_v53 = vadd.f32 %v3396_v5, %v401_v45  ;;  %v425_v54 = vadd.f32 %v3396_v5, %v402_v46  ;;  %v3071_v31 = vld [vmem:[%s4364_s1 + $0x88] sm:$0xff]   ;;  %v3072_v33 = vld [vmem:[%s4364_s1 + $0x40] sm:$0xff]  }
  0x25   : > { %473 = vst.msk [vmem:[#allocation2 + $0xd9] sm:$0x1] %vm439_vm1, %v3160_v1  ;;  %474 = vst.msk [vmem:[#allocation2 + $0xe9] sm:$0x1] %vm439_vm1, %v3160_v1  ;;  %v426_v57 = vadd.f32 %v3396_v5, %v403_v50  ;;  %2950 = vmatprep.subr.bf16.mxu1 %v3071_v31  ;;  %v3073_v36 = vld [vmem:[%s4364_s1] sm:$0xff]   ;;  %vm899_vm4 = vcmask 785408  }
  0x26   : > { %475 = vst.msk [vmem:[#allocation2 + $0xf9] sm:$0x1] %vm439_vm1, %v3160_v1  ;;  %476 = vst.msk [vmem:[#allocation2 + $0x109] sm:$0x1] %vm439_vm1, %v3160_v1  ;;  %v427_v58 = vadd.f32 %v3396_v5, %v404_v51  ;;  %2802 = vmatpush3.bf16.msra.mxu0 %v3064_v59  ;;  %2951 = vmatpush3.bf16.msra.mxu1 %v3071_v31 }
  0x27   : > { %477 = vst.msk [vmem:[#allocation2 + $0x119] sm:$0x1] %vm439_vm1, %v3160_v1  ;;  %478 = vst.msk [vmem:[#allocation2 + $0x129] sm:$0x1] %vm439_vm1, %v3160_v1  ;;  %2803 = vmatprep.subr.bf16.mxu0 %v3065_v60 }
  0x28   : > { %431 = vst.msk [vmem:[#allocation2 + $0x8] sm:$0x3] %vm430_vm2, %v3160_v1  ;;  %433 = vst.msk [vmem:[#allocation2 + $0xa8] sm:$0x3] %vm430_vm2, %v3160_v1 }
  0x29   : > { %436 = vst.msk [vmem:[#allocation2 + $0x98] sm:$0x3] %vm430_vm2, %v3160_v1  ;;  %438 = vst.msk [vmem:[#allocation2 + $0x138] sm:$0x3] %vm430_vm2, %v3160_v1 }
  0x2a   : > { %440 = vst.msk [vmem:[#allocation2] sm:$0x1] %vm439_vm1, %v3160_v1  ;;  %449 = vst.msk [vmem:[#allocation2 + $0x90] sm:$0x1] %vm439_vm1, %v3160_v1 }
  0x2b   : > { %450 = vst.msk [vmem:[#allocation2 + $0xa0] sm:$0x1] %vm439_vm1, %v3160_v1  ;;  %459 = vst.msk [vmem:[#allocation2 + $0x130] sm:$0x1] %vm439_vm1, %v3160_v1 }
  0x2c   : > { %460 = vst.msk [vmem:[#allocation2 + $0x9] sm:$0x1] %vm439_vm1, %v3160_v1  ;;  %469 = vst.msk [vmem:[#allocation2 + $0x99] sm:$0x1] %vm439_vm1, %v3160_v1 }
  0x2d   : > { %470 = vst.msk [vmem:[#allocation2 + $0xa9] sm:$0x1] %vm439_vm1, %v3160_v1  ;;  %479 = vst.msk [vmem:[#allocation2 + $0x139] sm:$0x1] %vm439_vm1, %v3160_v1 }
  0x2e   : > { %482 = vst.msk [vmem:[#allocation2 + $0x21] sm:$0xff] %vm4378_vm0, %v413_v22  ;;  %483 = vst.msk [vmem:[#allocation2 + $0x31] sm:$0xff] %vm4378_vm0, %v414_v23  ;;  %v3066_v22 = vld [vmem:[%s4364_s1 + $0x18] sm:$0xff]   ;;  %v3067_v23 = vld [vmem:[%s4364_s1 + $0x50] sm:$0xff]  }
  0x2f   : > { %481 = vst.msk [vmem:[#allocation2 + $0x11] sm:$0xff] %vm4378_vm0, %v412_v24  ;;  %484 = vst.msk [vmem:[#allocation2 + $0x41] sm:$0xff] %vm4378_vm0, %v415_v26  ;;  %v521_v3 = vld [vmem:[#allocation2 + $0x1] sm:$0xff]  ;;  %2804 = vmatpush3.bf16.msra.mxu0 %v3066_v22  ;;  %v3068_v24 = vld [vmem:[%s4364_s1 + $0x10] sm:$0xff]  }
  0x30   : > { %485 = vst.msk [vmem:[#allocation2 + $0x51] sm:$0xff] %vm4378_vm0, %v416_v27  ;;  %486 = vst.msk [vmem:[#allocation2 + $0x61] sm:$0xff] %vm4378_vm0, %v417_v28  ;;  %2805 = vmatprep.subr.bf16.mxu0 %v3067_v23  ;;  %v3069_v27 = vld [vmem:[%s4364_s1 + $0x48] sm:$0xff]  }
  0x31   : > { %487 = vst.msk [vmem:[#allocation2 + $0x71] sm:$0xff] %vm4378_vm0, %v418_v32  ;;  %488 = vst.msk [vmem:[#allocation2 + $0x81] sm:$0xff] %vm4378_vm0, %v419_v37  ;;  %v3074_v37 = vld [vmem:[%s4364_s1 + $0x80] sm:$0xff]  }
  0x32   : > { %489 = vst.msk [vmem:[#allocation2 + $0xb1] sm:$0xff] %vm4378_vm0, %v420_v43  ;;  %490 = vst.msk [vmem:[#allocation2 + $0xc1] sm:$0xff] %vm4378_vm0, %v421_v44  ;;  %2952 = vmatprep.subr.bf16.mxu1 %v3074_v37  ;;  %v529_v60 = vld [vmem:[#allocation2 + $0xa1] sm:$0xff] }
  0x33   : > { %v545_v56 = vld [vmem:[#allocation2 + $0x2] sm:$0xff]  ;;  %491 = vst.msk [vmem:[#allocation2 + $0xd1] sm:$0xff] %vm4378_vm0, %v422_v48  ;;  %492 = vst.msk [vmem:[#allocation2 + $0xe1] sm:$0xff] %vm4378_vm0, %v423_v49  ;;  %2806 = vmatpush3.bf16.msra.mxu0 %v3068_v24  ;;  %2953 = vmatpush3.bf16.msra.mxu1 %v3074_v37  ;;  %v3558_v46 = vld [vmem:[#allocation2 + $0x92] sm:$0xff] }
  0x34   : > { %493 = vst.msk [vmem:[#allocation2 + $0xf1] sm:$0xff] %vm4378_vm0, %v424_v53  ;;  %494 = vst.msk [vmem:[#allocation2 + $0x101] sm:$0xff] %vm4378_vm0, %v425_v54  ;;  %2807 = vmatprep.subr.bf16.mxu0 %v3069_v27  ;;  %v649_v48 = vld [vmem:[#allocation2 + $0x90] sm:$0xff] }
  0x35   : > { %v642_v61 = vld [vmem:[#allocation2 + $0x20] sm:$0xff]  ;;  %v643_v62 = vld [vmem:[#allocation2 + $0x30] sm:$0xff]  ;;  %495 = vst.msk [vmem:[#allocation2 + $0x111] sm:$0xff] %vm4378_vm0, %v426_v57  ;;  %496 = vst.msk [vmem:[#allocation2 + $0x121] sm:$0xff] %vm4378_vm0, %v427_v58 }
  0x36   : > { %v617_v63 = vld [vmem:[#allocation2 + $0x12] sm:$0xff]  ;;  %v3485_v0 = vpack.c.bf16 %v643_v62, %v642_v61  ;;  %v618_v2 = vld [vmem:[#allocation2 + $0x22] sm:$0xff] }
  0x37   : > { %v3487_v4 = vld [vmem:[#allocation2 + $0x11] sm:$0xff]  ;;  %v633_v5 = vpack.c.bf16 %v618_v2, %v617_v63  ;;  %v561_v7 = vpack.c.bf16 %v617_v63, %v545_v56  ;;  %v3495_v11 = vld [vmem:[#allocation2 + $0x21] sm:$0xff]  ;;  %2808 = vmatpush3.bf16.msra.mxu0 %v3070_v30 }
  0x38   : > { %v619_v6 = vld [vmem:[#allocation2 + $0x32] sm:$0xff]  ;;  %818 = vrot.lane.b32.xlu1 %v3485_v0, %s4376_s30  ;;  %v537_v9 = vpack.c.bf16 %v3487_v4, %v521_v3  ;;  %v620_v15 = vld [vmem:[#allocation2 + $0x42] sm:$0xff]  ;;  %2809 = vmatprep.subr.bf16.mxu0 %v3072_v33 }
  0x39   : > { %v562_v8 = vpack.c.bf16 %v619_v6, %v618_v2  ;;  %794 = vrot.lane.b32.xlu0 %v633_v5, %s3162_s25  ;;  %v3493_v10 = vld [vmem:[#allocation2 + $0x10] sm:$0xff]  ;;  %v634_v16 = vpack.c.bf16 %v620_v15, %v619_v6  ;;  %v644_v17 = vld [vmem:[#allocation2 + $0x40] sm:$0xff] }
  0x3a   : > { %v3497_v12 = vld [vmem:[#allocation2 + $0x31] sm:$0xff]  ;;  %v585_v13 = vpack.c.bf16 %v642_v61, %v3493_v10  ;;  %v3508_v19 = vld [vmem:[#allocation2 + $0x41] sm:$0xff]  ;;  %v586_v25 = vpack.c.bf16 %v644_v17, %v643_v62 }
  0x3b   : > { %2954 = vmatprep.mubr.msk.bf16.mxu1 %vm4378_vm0, %v562_v8  ;;  %v682_v14 = vpack.c.bf16 %v3497_v12, %v3495_v11  ;;  %v645_v18 = vld [vmem:[#allocation2 + $0x50] sm:$0xff]  ;;  %v622_v29 = vld [vmem:[#allocation2 + $0x62] sm:$0xff]  ;;  %2810 = vmatpush3.bf16.msra.mxu0 %v3073_v36 }
  0x3c   : > { %746 = vrot.lane.b32.xlu1 %v561_v7, %s4376_s30  ;;  %v3510_v20 = vld [vmem:[#allocation2 + $0x51] sm:$0xff]  ;;  %v3513_v21 = vpack.c.bf16 %v645_v18, %v644_v17  ;;  %v646_v32 = vld [vmem:[#allocation2 + $0x60] sm:$0xff] }
  0x3d   : > { %722 = vrot.lane.b32.xlu0 %v537_v9, %s3162_s25  ;;  %v621_v26 = vld [vmem:[#allocation2 + $0x52] sm:$0xff]  ;;  %v683_v28 = vpack.c.bf16 %v3510_v20, %v3508_v19  ;;  %v3550_v39 = vld [vmem:[#allocation2 + $0x61] sm:$0xff]  ;;  %v587_v43 = vpack.c.bf16 %v646_v32, %v645_v18 }
  0x3e   : > { %v635_v34 = vpack.c.bf16 %v622_v29, %v621_v26  ;;  %v647_v35 = vld [vmem:[#allocation2 + $0x70] sm:$0xff]  ;;  %v563_v38 = vpack.c.bf16 %v621_v26, %v620_v15  ;;  %v624_v44 = vld [vmem:[#allocation2 + $0x82] sm:$0xff] }
  0x3f   : > { %v3552_v40 = vld [vmem:[#allocation2 + $0x71] sm:$0xff]  ;;  %v3555_v41 = vpack.c.bf16 %v647_v35, %v646_v32  ;;  %v709_v50 = vpack.c.bf16 %v3558_v46, %v624_v44  ;;  %v648_v51 = vld [vmem:[#allocation2 + $0x80] sm:$0xff] }
  0x40   : > { %770 = vrot.lane.b32.xlu1 %v585_v13, %s4374_s12  ;;  %v623_v42 = vld [vmem:[#allocation2 + $0x72] sm:$0xff]  ;;  %v684_v47 = vpack.c.bf16 %v3552_v40, %v3550_v39  ;;  %2955 = vmatmul.mubr.msk.bf16.vlgmr.msra.gmra.mxu1 %vm4378_vm0, %v563_v38  ;;  %v626_v52 = vld [vmem:[#allocation2 + $0xc2] sm:$0xff]  ;;  %v661_v55 = vpack.c.bf16 %v649_v48, %v648_v51  ;;  %v588_v58 = vpack.c.bf16 %v648_v51, %v647_v35 }
  0x41   : > { %842 = vrot.lane.b32.xlu0 %v682_v14, %s4374_s12  ;;  %v564_v45 = vpack.c.bf16 %v623_v42, %v622_v29  ;;  %v636_v49 = vpack.c.bf16 %v624_v44, %v623_v42  ;;  %v627_v53 = vld [vmem:[#allocation2 + $0xd2] sm:$0xff]  ;;  %v3572_v56 = vld [vmem:[#allocation2 + $0x81] sm:$0xff] }
  0x42   : > { %v566_v54 = vpack.c.bf16 %v627_v53, %v626_v52  ;;  %v673_v57 = vld [vmem:[#allocation2 + $0x91] sm:$0xff]  ;;  %v628_v63 = vld [vmem:[#allocation2 + $0xe2] sm:$0xff] }
  0x43   : > { %2958 = vmatprep.mubr.msk.bf16.mxu1 %vm4378_vm0, %v564_v45  ;;  %v685_v59 = vpack.c.bf16 %v673_v57, %v3572_v56  ;;  %v3578_v61 = vld [vmem:[#allocation2 + $0xb1] sm:$0xff]  ;;  %v630_v3 = vld [vmem:[#allocation2 + $0x102] sm:$0xff]  ;;  %v638_v26 = vpack.c.bf16 %v628_v63, %v627_v53 }
  0x44   : > { %724 = vrot.lane.b32.xlu1 %v682_v14, %s3162_s25  ;;  %v625_v62 = vld [vmem:[#allocation2 + $0xb2] sm:$0xff]  ;;  %v541_v7 = vpack.c.bf16 %v3578_v61, %v529_v60  ;;  %v553_v13 = vld [vmem:[#allocation2 + $0xa2] sm:$0xff] }
  0x45   : > { %796 = vrot.lane.b32.xlu0 %v634_v16, %s3162_s25  ;;  %v629_v2 = vld [vmem:[#allocation2 + $0xf2] sm:$0xff]  ;;  %v637_v9 = vpack.c.bf16 %v626_v52, %v625_v62  ;;  %v650_v14 = vld [vmem:[#allocation2 + $0xc0] sm:$0xff]  ;;  %v565_v16 = vpack.c.bf16 %v625_v62, %v553_v13  ;;  %v609_v62 = vpack.c.bf16 %v3495_v11, %v3487_v4 }
  0x46   : > { %v567_v5 = vpack.c.bf16 %v629_v2, %v628_v63  ;;  %v631_v6 = vld [vmem:[#allocation2 + $0x112] sm:$0xff]  ;;  %v3591_v22 = vld [vmem:[#allocation2 + $0xc1] sm:$0xff]  ;;  %v639_v37 = vpack.c.bf16 %v630_v3, %v629_v2 }
  0x47   : > { %v651_v15 = vld [vmem:[#allocation2 + $0xd0] sm:$0xff]  ;;  %v652_v27 = vld [vmem:[#allocation2 + $0xe0] sm:$0xff] }
  0x48   : > { %748 = vrot.lane.b32.xlu1 %v562_v8, %s4376_s30  ;;  %2959 = vmatmul.mubr.msk.bf16.gmra.mxu1 %vm4378_vm0, %v709_v50  ;;  %v568_v8 = vpack.c.bf16 %v631_v6, %v630_v3  ;;  %v3587_v17 = vpack.c.bf16 %v651_v15, %v650_v14  ;;  %v3589_v18 = vld [vmem:[#allocation2 + $0xb0] sm:$0xff]  ;;  %v3607_v30 = vld [vmem:[#allocation2 + $0xe1] sm:$0xff]  ;;  %v590_v32 = vpack.c.bf16 %v652_v27, %v651_v15 }
  0x49   : > { %820 = vrot.lane.b32.xlu0 %v3513_v21, %s4376_s30  ;;  %2962 = vmatprep.mubr.msk.bf16.mxu1 %vm4378_vm0, %v566_v54  ;;  %v3593_v23 = vld [vmem:[#allocation2 + $0xd1] sm:$0xff]  ;;  %v589_v24 = vpack.c.bf16 %v650_v14, %v3589_v18  ;;  %v3623_v44 = vld [vmem:[#allocation2 + $0x101] sm:$0xff]  ;;  %v610_v15 = vpack.c.bf16 %v3508_v19, %v3497_v12 }
  0x4a   : > { %v3609_v31 = vld [vmem:[#allocation2 + $0xf1] sm:$0xff]  ;;  %v656_v50 = vld [vmem:[#allocation2 + $0x120] sm:$0xff] }
  0x4b   : > { %v687_v33 = vpack.c.bf16 %v3609_v31, %v3607_v30  ;;  %v705_v35 = vld [vmem:[#allocation2 + $0x132] sm:$0xff]  ;;  %v3636_v53 = vld [vmem:[#allocation2 + $0x121] sm:$0xff] }
  0x4c   : > { %772 = vrot.lane.b32.xlu1 %v586_v25, %s4374_s12  ;;  %v686_v25 = vpack.c.bf16 %v3593_v23, %v3591_v22  ;;  %v655_v42 = vld [vmem:[#allocation2 + $0x110] sm:$0xff] }
  0x4d   : > { %844 = vrot.lane.b32.xlu0 %v683_v28, %s4374_s12  ;;  %v657_v51 = vld [vmem:[#allocation2 + $0x130] sm:$0xff] }
  0x4e   : > { %v665_v52 = vpack.c.bf16 %v657_v51, %v656_v50 }
  0x50   : > { %726 = vrot.lane.b32.xlu1 %v683_v28, %s3162_s25  ;;  %2963 = vmatmul.mubr.msk.bf16.gmra.mxu1 %vm4378_vm0, %v567_v5  ;;  %v653_v28 = vld [vmem:[#allocation2 + $0xf0] sm:$0xff] }
  0x51   : > { %798 = vrot.lane.b32.xlu0 %v635_v34, %s3162_s25  ;;  %2966 = vmatprep.mubr.msk.bf16.mxu1 %vm4378_vm0, %v568_v8  ;;  %v3605_v29 = vpack.c.bf16 %v653_v28, %v652_v27  ;;  %v632_v34 = vld [vmem:[#allocation2 + $0x122] sm:$0xff] }
  0x52   : > { %v713_v36 = vpack.c.bf16 %v705_v35, %v632_v34 }
  0x54   : > { %750 = vrot.lane.b32.xlu1 %v563_v38, %s4376_s30  ;;  %v654_v38 = vld [vmem:[#allocation2 + $0x100] sm:$0xff] }
  0x55   : > { %822 = vrot.lane.b32.xlu0 %v3555_v41, %s4376_s30 }
  0x58   : > { %774 = vrot.lane.b32.xlu1 %v587_v43, %s4374_s12  ;;  %2967 = vmatmul.mubr.msk.bf16.gmra.mxu1 %vm4378_vm0, %v713_v36  ;;  %v3621_v43 = vpack.c.bf16 %v655_v42, %v654_v38  ;;  %v611_v36 = vpack.c.bf16 %v3550_v39, %v3510_v20 }
  0x59   : > { %846 = vrot.lane.b32.xlu0 %v684_v47, %s4374_s12 }
  0x5c   : > { %728 = vrot.lane.b32.xlu1 %v684_v47, %s3162_s25  ;;  %v591_v47 = vpack.c.bf16 %v654_v38, %v653_v28 }
  0x5d   : > { %800 = vrot.lane.b32.xlu0 %v636_v49, %s3162_s25  ;;  %v640_v49 = vpack.c.bf16 %v632_v34, %v631_v6 }
  0x60   : > { %752 = vrot.lane.b32.xlu1 %v564_v45, %s4376_s30  ;;  %v3625_v45 = vld [vmem:[#allocation2 + $0x111] sm:$0xff] }
  0x61   : > { %824 = vrot.lane.b32.xlu0 %v661_v55, %s4376_s30  ;;  %v688_v48 = vpack.c.bf16 %v3625_v45, %v3623_v44  ;;  %v592_v55 = vpack.c.bf16 %v656_v50, %v655_v42 }
  0x64   : > { %776 = vrot.lane.b32.xlu1 %v588_v58, %s4374_s12  ;;  %v497_v58 = vld [vmem:[#allocation2] sm:$0xff] }
  0x65   : > { %848 = vrot.lane.b32.xlu0 %v685_v59, %s4374_s12  ;;  %v513_v63 = vpack.c.bf16 %v3493_v10, %v497_v58 }
  0x68   : > { %730 = vrot.lane.b32.xlu1 %v541_v7, %s3162_s25 }
  0x69   : > { %802 = vrot.lane.b32.xlu0 %v637_v9, %s3162_s25 }
  0x6c   : > { %754 = vrot.lane.b32.xlu1 %v565_v16, %s4376_s30 }
  0x6d   : > { %826 = vrot.lane.b32.xlu0 %v3587_v17, %s4376_s30 }
  0x70   : > { %778 = vrot.lane.b32.xlu1 %v589_v24, %s4374_s12 }
  0x71   : > { %850 = vrot.lane.b32.xlu0 %v686_v25, %s4374_s12 }
  0x74   : > { %732 = vrot.lane.b32.xlu1 %v686_v25, %s3162_s25 }
  0x75   : > { %804 = vrot.lane.b32.xlu0 %v638_v26, %s3162_s25 }
  0x78   : > { %756 = vrot.lane.b32.xlu1 %v566_v54, %s4376_s30  ;;  %v681_v54 = vld [vmem:[#allocation2 + $0x131] sm:$0xff] }
  0x79   : > { %828 = vrot.lane.b32.xlu0 %v3605_v29, %s4376_s30  ;;  %v689_v57 = vpack.c.bf16 %v681_v54, %v3636_v53  ;;  %v612_v54 = vpack.c.bf16 %v3572_v56, %v3552_v40  ;;  %v505_v40 = vld [vmem:[#allocation2 + $0xa0] sm:$0xff] }
  0x7c   : > { %780 = vrot.lane.b32.xlu1 %v590_v32, %s4374_s12 }
  0x7d   : > { %852 = vrot.lane.b32.xlu0 %v687_v33, %s4374_s12 }
  0x80   : > { %734 = vrot.lane.b32.xlu1 %v687_v33, %s3162_s25 }
  0x81   : > { %806 = vrot.lane.b32.xlu0 %v639_v37, %s3162_s25 }
  0x84   : > { %758 = vrot.lane.b32.xlu1 %v567_v5, %s4376_s30 }
  0x85   : > { %830 = vrot.lane.b32.xlu0 %v3621_v43, %s4376_s30 }
  0x88   : > { %782 = vrot.lane.b32.xlu1 %v591_v47, %s4374_s12 }
  0x89   : > { %854 = vrot.lane.b32.xlu0 %v688_v48, %s4374_s12 }
  0x8c   : > { %736 = vrot.lane.b32.xlu1 %v688_v48, %s3162_s25 }
  0x8d   : > { %808 = vrot.lane.b32.xlu0 %v640_v49, %s3162_s25 }
  0x90   : > { %760 = vrot.lane.b32.xlu1 %v568_v8, %s4376_s30 }
  0x91   : > { %832 = vrot.lane.b32.xlu0 %v665_v52, %s4376_s30  ;;  %s4384_s30 = smov 64  }
  0x94   : > { %784 = vrot.lane.b32.xlu1 %v592_v55, %s4374_s12 }
  0x95   : > { %856 = vrot.lane.b32.xlu0 %v689_v57, %s4374_s12  ;;  %s4385_s12 = smov 96  }
  0xaa   : > { %v819_v59 = vpop.permute.xlu1 %818 }
  0xab   : > { %v795_v60 = vpop.permute.xlu0 %794 }
  0xac   : > { %v926_v5 = vsel %vm4378_vm0, %v609_v62, %v795_v60 }
  0xad   : > { %v949_v13 = vsel %vm882_vm3, %v926_v5, %v819_v59 }
  0xae   : > { %v747_v2 = vpop.permute.xlu1 %746 }
  0xaf   : > { %v723_v3 = vpop.permute.xlu0 %722 }
  0xb0   : > { %v860_v6 = vsel %vm4378_vm0, %v513_v63, %v723_v3 }
  0xb1   : > { %v884_v8 = vsel %vm882_vm3, %v860_v6, %v747_v2  ;;  %v517_v6 = vpack.c.bf16 %v3589_v18, %v505_v40 }
  0xb2   : > { %v771_v7 = vpop.permute.xlu1 %770 }
  0xb3   : > { %v843_v9 = vpop.permute.xlu0 %842  ;;  %v901_v14 = vsel %vm899_vm4, %v884_v8, %v771_v7 }
  0xb4   : > { %v965_v4 = vsel %vm899_vm4, %v949_v13, %v843_v9 }
  0xb5   : > { %1195 = vmatprep.mubr.bf16.mxu0 %v965_v4 }
  0xb6   : > { %1196 = vmatmul.mubr.bf16.vlgmr.msra.gmra.mxu0 %v901_v14  ;;  %v725_v10 = vpop.permute.xlu1 %724 }
  0xb7   : > { %v797_v11 = vpop.permute.xlu0 %796  ;;  %v863_v25 = vsel %vm4378_vm0, %v3485_v0, %v725_v10 }
  0xb8   : > { %v929_v26 = vsel %vm4378_vm0, %v610_v15, %v797_v11 }
  0xba   : > { %v749_v16 = vpop.permute.xlu1 %748 }
  0xbb   : > { %v821_v24 = vpop.permute.xlu0 %820  ;;  %v886_v27 = vsel %vm882_vm3, %v863_v25, %v749_v16 }
  0xbc   : > { %v951_v32 = vsel %vm882_vm3, %v929_v26, %v821_v24 }
  0xbe   : > { %v773_v28 = vpop.permute.xlu1 %772 }
  0xbf   : > { %v845_v33 = vpop.permute.xlu0 %844  ;;  %v904_v34 = vsel %vm899_vm4, %v886_v27, %v773_v28 }
  0xc0   : > { %v968_v35 = vsel %vm899_vm4, %v951_v32, %v845_v33 }
  0xc1   : > { %1203 = vmatprep.mubr.bf16.mxu0 %v968_v35 }
  0xc2   : > { %1204 = vmatmul.mubr.bf16.gmra.mxu0 %v904_v34  ;;  %v727_v12 = vpop.permute.xlu1 %726 }
  0xc3   : > { %v799_v19 = vpop.permute.xlu0 %798  ;;  %v866_v38 = vsel %vm4378_vm0, %v3513_v21, %v727_v12 }
  0xc4   : > { %v932_v42 = vsel %vm4378_vm0, %v611_v36, %v799_v19  ;;  %v615_v19 = vpack.c.bf16 %v3623_v44, %v3609_v31 }
  0xc6   : > { %v751_v0 = vpop.permute.xlu1 %750 }
  0xc7   : > { %v823_v37 = vpop.permute.xlu0 %822  ;;  %v888_v47 = vsel %vm882_vm3, %v866_v38, %v751_v0 }
  0xc8   : > { %v953_v49 = vsel %vm882_vm3, %v932_v42, %v823_v37 }
  0xca   : > { %v775_v48 = vpop.permute.xlu1 %774 }
  0xcb   : > { %v847_v50 = vpop.permute.xlu0 %846  ;;  %v907_v51 = vsel %vm899_vm4, %v888_v47, %v775_v48 }
  0xcc   : > { %v971_v52 = vsel %vm899_vm4, %v953_v49, %v847_v50 }
  0xcd   : > { %1211 = vmatprep.mubr.bf16.mxu0 %v971_v52 }
  0xce   : > { %1212 = vmatmul.mubr.bf16.gmra.mxu0 %v907_v51  ;;  %v729_v20 = vpop.permute.xlu1 %728  ;;  %v616_v51 = vpack.c.bf16 %v3636_v53, %v3625_v45  ;;  %v3718_v45 = vld [vmem:[%s4365_s2 + $0x88] sm:$0xff]   ;;  %v3077_v53 = vld [vmem:[%s4365_s2 + $0x78] sm:$0xff]  }
  0xcf   : > { %v801_v39 = vpop.permute.xlu0 %800  ;;  %v869_v57 = vsel %vm4378_vm0, %v3555_v41, %v729_v20  ;;  %v613_v41 = vpack.c.bf16 %v3591_v22, %v3578_v61  ;;  %v614_v22 = vpack.c.bf16 %v3607_v30, %v3593_v23  ;;  %2970 = vmatprep.subr.bf16.mxu0 %v3718_v45  ;;  %2869 = vmatprep.subr.bf16.mxu1 %v3077_v53 }
  0xd0   : > { %v935_v58 = vsel %vm4378_vm0, %v612_v54, %v801_v39  ;;  %2971 = vmatpush3.bf16.msra.mxu0 %v3718_v45 }
  0xd2   : > { %v753_v21 = vpop.permute.xlu1 %752 }
  0xd3   : > { %v825_v55 = vpop.permute.xlu0 %824  ;;  %v890_v59 = vsel %vm882_vm3, %v869_v57, %v753_v21 }
  0xd4   : > { %v955_v62 = vsel %vm882_vm3, %v935_v58, %v825_v55 }
  0xd6   : > { %v777_v60 = vpop.permute.xlu1 %776 }
  0xd7   : > { %v849_v63 = vpop.permute.xlu0 %848  ;;  %v910_v2 = vsel %vm899_vm4, %v890_v59, %v777_v60  ;;  %v3078_v60 = vld [vmem:[%s4365_s2 + $0x38] sm:$0xff]  }
  0xd8   : > { %v974_v3 = vsel %vm899_vm4, %v955_v62, %v849_v63  ;;  %v3079_v62 = vld [vmem:[%s4365_s2 + $0x70] sm:$0xff]   ;;  %2870 = vmatpush3.bf16.msra.mxu1 %v3078_v60 }
  0xd9   : > { %1219 = vmatprep.mubr.bf16.mxu0 %v974_v3  ;;  %v3080_v63 = vld [vmem:[%s4365_s2 + $0x30] sm:$0xff]   ;;  %2871 = vmatprep.subr.bf16.mxu1 %v3079_v62  ;;  %v3081_v3 = vld [vmem:[%s4365_s2 + $0x68] sm:$0xff]  }
  0xda   : > { %1220 = vmatmul.mubr.bf16.gmra.mxu0 %v910_v2  ;;  %v731_v56 = vpop.permute.xlu1 %730 }
  0xdb   : > { %v803_v5 = vpop.permute.xlu0 %802  ;;  %v872_v9 = vsel %vm4378_vm0, %v517_v6, %v731_v56  ;;  %v3082_v56 = vld [vmem:[%s4365_s2 + $0x28] sm:$0xff]   ;;  %v3750_v6 = vld [vmem:[%s4368_s5] ss:$0 sm:$0xff] }
  0xdc   : > { %v938_v13 = vsel %vm4378_vm0, %v613_v41, %v803_v5  ;;  %2872 = vmatpush3.bf16.msra.mxu1 %v3080_v63 }
  0xdd   : > { %2873 = vmatprep.subr.bf16.mxu1 %v3081_v3 }
  0xde   : > { %v755_v7 = vpop.permute.xlu1 %754 }
  0xdf   : > { %v827_v8 = vpop.permute.xlu0 %826  ;;  %v892_v14 = vsel %vm882_vm3, %v872_v9, %v755_v7  ;;  %v3083_v7 = vld [vmem:[%s4365_s2 + $0x60] sm:$0xff]  }
  0xe0   : > { %v957_v10 = vsel %vm882_vm3, %v938_v13, %v827_v8  ;;  %2874 = vmatpush3.bf16.msra.mxu1 %v3082_v56 }
  0xe1   : > { %2875 = vmatprep.subr.bf16.mxu1 %v3083_v7 }
  0xe2   : > { %v779_v4 = vpop.permute.xlu1 %778 }
  0xe3   : > { %v851_v11 = vpop.permute.xlu0 %850  ;;  %v913_v15 = vsel %vm899_vm4, %v892_v14, %v779_v4  ;;  %v3084_v14 = vld [vmem:[%s4365_s2 + $0x20] sm:$0xff]  }
  0xe4   : > { %v977_v16 = vsel %vm899_vm4, %v957_v10, %v851_v11  ;;  %v3762_v4 = vld [vmem:[%s4370_s7] ss:$0 sm:$0xff]  ;;  %2876 = vmatpush3.bf16.msra.mxu1 %v3084_v14 }
  0xe5   : > { %1227 = vmatprep.mubr.bf16.mxu0 %v977_v16 }
  0xe6   : > { %1228 = vmatmul.mubr.bf16.gmra.mxu0 %v913_v15  ;;  %v733_v18 = vpop.permute.xlu1 %732 }
  0xe7   : > { %v805_v61 = vpop.permute.xlu0 %804  ;;  %v875_v26 = vsel %vm4378_vm0, %v3587_v17, %v733_v18 }
  0xe8   : > { %v941_v27 = vsel %vm4378_vm0, %v614_v22, %v805_v61  ;;  %v3085_v22 = vld [vmem:[%s4365_s2 + $0x58] sm:$0xff]  }
  0xe9   : > { %2877 = vmatprep.subr.bf16.mxu1 %v3085_v22 }
  0xea   : > { %v757_v24 = vpop.permute.xlu1 %756 }
  0xeb   : > { %v829_v25 = vpop.permute.xlu0 %828  ;;  %v894_v28 = vsel %vm882_vm3, %v875_v26, %v757_v24  ;;  %v3086_v24 = vld [vmem:[%s4365_s2 + $0x18] sm:$0xff]  }
  0xec   : > { %v959_v33 = vsel %vm882_vm3, %v941_v27, %v829_v25  ;;  %2878 = vmatpush3.bf16.msra.mxu1 %v3086_v24 }
  0xee   : > { %v781_v32 = vpop.permute.xlu1 %780 }
  0xef   : > { %v853_v34 = vpop.permute.xlu0 %852  ;;  %v916_v35 = vsel %vm899_vm4, %v894_v28, %v781_v32 }
  0xf0   : > { %v980_v12 = vsel %vm899_vm4, %v959_v33, %v853_v34  ;;  %v3087_v33 = vld [vmem:[%s4365_s2 + $0x50] sm:$0xff]  }
  0xf1   : > { %1235 = vmatprep.mubr.bf16.mxu0 %v980_v12  ;;  %v3088_v34 = vld [vmem:[%s4365_s2 + $0x10] sm:$0xff]   ;;  %2879 = vmatprep.subr.bf16.mxu1 %v3087_v33 }
  0xf2   : > { %1236 = vmatmul.mubr.bf16.gmra.mxu0 %v916_v35  ;;  %v735_v23 = vpop.permute.xlu1 %734  ;;  %2880 = vmatpush3.bf16.msra.mxu1 %v3088_v34 }
  0xf3   : > { %v807_v30 = vpop.permute.xlu0 %806  ;;  %v878_v0 = vsel %vm4378_vm0, %v3605_v29, %v735_v23 }
  0xf4   : > { %v944_v37 = vsel %vm4378_vm0, %v615_v19, %v807_v30 }
  0xf6   : > { %v759_v17 = vpop.permute.xlu1 %758 }
  0xf7   : > { %v831_v36 = vpop.permute.xlu0 %830  ;;  %v896_v38 = vsel %vm882_vm3, %v878_v0, %v759_v17  ;;  %v1451_v17 = vld [vmem:[#allocation2 + $0x1] sm:$0xff] }
  0xf8   : > { %v961_v47 = vsel %vm882_vm3, %v944_v37, %v831_v36  ;;  %v3089_v36 = vld [vmem:[%s4365_s2 + $0x48] sm:$0xff]  }
  0xf9   : > { %v3090_v0 = vld [vmem:[%s4365_s2 + $0x8] sm:$0xff]   ;;  %2881 = vmatprep.subr.bf16.mxu1 %v3089_v36 }
  0xfa   : > { %v783_v42 = vpop.permute.xlu1 %782  ;;  %2882 = vmatpush3.bf16.msra.mxu1 %v3090_v0 }
  0xfb   : > { %v855_v48 = vpop.permute.xlu0 %854  ;;  %v919_v49 = vsel %vm899_vm4, %v896_v38, %v783_v42 }
  0xfc   : > { %v983_v50 = vsel %vm899_vm4, %v961_v47, %v855_v48 }
  0xfd   : > { %1243 = vmatprep.mubr.bf16.mxu0 %v983_v50 }
  0xfe   : > { %1244 = vmatmul.mubr.bf16.gmra.mxu0 %v919_v49  ;;  %v737_v31 = vpop.permute.xlu1 %736 }
  0xff   : > { %v809_v44 = vpop.permute.xlu0 %808  ;;  %v881_v20 = vsel %vm4378_vm0, %v3621_v43, %v737_v31  ;;  %v3725_v43 = vld [vmem:[%s4365_s2 + $0x80] sm:$0xff]  }
 0x100   : > { %v947_v39 = vsel %vm4378_vm0, %v616_v51, %v809_v44  ;;  %2972 = vmatprep.subr.bf16.mxu0 %v3725_v43  ;;  %v2956_v2 = vpop.f32.mrf.mxu1  ;;  %v1475_v44 = vld [vmem:[#allocation2 + $0x2] sm:$0xff] }
 0x101   : > { %2973 = vmatpush3.bf16.msra.mxu0 %v3725_v43 }
 0x102   : > { %v761_v29 = vpop.permute.xlu1 %760  ;;  %v1294_v41 = vpop.f32.mrf.mxu1 }
 0x103   : > { %v833_v52 = vpop.permute.xlu0 %832  ;;  %v898_v54 = vsel %vm882_vm3, %v881_v20, %v761_v29  ;;  %v3091_v29 = vld [vmem:[%s4365_s2 + $0x40] sm:$0xff]  }
 0x104   : > { %v963_v55 = vsel %vm882_vm3, %v947_v39, %v833_v52  ;;  %v2957_v11 = vpop.f32.mrf.mxu1  ;;  %v3092_v52 = vld [vmem:[%s4365_s2] sm:$0xff]   ;;  %2883 = vmatprep.subr.bf16.mxu1 %v3091_v29 }
 0x105   : > { %2884 = vmatpush3.bf16.msra.mxu1 %v3092_v52 }
 0x106   : > { %v785_v21 = vpop.permute.xlu1 %784  ;;  %v1297_v25 = vpop.f32.mrf.mxu1  ;;  %3006 = vmatprep.subr.bf16.mxu1 %v3718_v45 }
 0x107   : > { %v857_v57 = vpop.permute.xlu0 %856  ;;  %v922_v58 = vsel %vm899_vm4, %v898_v54, %v785_v21 }
 0x108   : > { %v986_v59 = vsel %vm899_vm4, %v963_v55, %v857_v57  ;;  %v3793_v51 = vpop.f32.mrf.mxu1 }
 0x109   : > { %1251 = vmatprep.mubr.bf16.mxu0 %v986_v59 }
 0x10a   : > { %1252 = vmatmul.mubr.bf16.gmra.mxu0 %v922_v58  ;;  %v1310_v62 = vpop.f32.mrf.mxu1 }
 0x10c   : > { %v2961_v7 = vpop.f32.mrf.mxu1 }
 0x10e   : > { %v1313_v24 = vpop.f32.mrf.mxu1 }
 0x176   : > { %v2811_v40 = vpop.f32.mrf.mxu0 }
 0x178   : > { %v2812_v5 = vpop.f32.mrf.mxu0 }
 0x179   : > { %v2813_v8 = vadd.f32 %v2812_v5, %v2811_v40 }
 0x17a   : > { %v2814_v9 = vpop.f32.mrf.mxu0 }
 0x17b   : > { %v1198_v13 = vadd.f32 %v2813_v8, %v3750_v6 }
 0x17c   : > { %v2815_v10 = vpop.f32.mrf.mxu0 }
 0x17d   : > { %v1295_v15 = vadd.f32 %v1294_v41, %v1198_v13  ;;  %v2816_v16 = vadd.f32 %v2815_v10, %v2814_v9 }
 0x17f   : > { %vm1357_vm5 = vcmp.ge.f32.partialorder %v1295_v15, 0.0  ;;  %v1379_v18 = vmul.f32 %v3762_v4, %v1295_v15  ;;  %v1201_v61 = vadd.f32 %v2816_v16, %v3750_v6 }
 0x181   : > { %v1395_v26 = vsel %vm1357_vm5, %v1295_v15, %v1379_v18  ;;  %v1298_v27 = vadd.f32 %v1297_v25, %v1201_v61 }
 0x182   : > { %1411 = vst.msk [vmem:[#allocation2 + $0x11] sm:$0xff] %vm4378_vm0, %v1395_v26  ;;  %v2817_v28 = vpop.f32.mrf.mxu0 }
 0x183   : > { %vm1358_vm6 = vcmp.ge.f32.partialorder %v1298_v27, 0.0  ;;  %v1380_v32 = vmul.f32 %v3762_v4, %v1298_v27 }
 0x184   : > { %v2818_v35 = vpop.f32.mrf.mxu0 }
 0x185   : > { %v1396_v12 = vsel %vm1358_vm6, %v1298_v27, %v1380_v32  ;;  %v2819_v23 = vadd.f32 %v2818_v35, %v2817_v28 }
 0x186   : > { %1412 = vst.msk [vmem:[#allocation2 + $0x21] sm:$0xff] %vm4378_vm0, %v1396_v12  ;;  %v2820_v30 = vpop.f32.mrf.mxu0 }
 0x187   : > { %v1206_v19 = vadd.f32 %v2819_v23, %v3750_v6 }
 0x188   : > { %v2821_v37 = vpop.f32.mrf.mxu0 }
 0x189   : > { %v1303_v38 = vadd.f32 %v2956_v2, %v1206_v19  ;;  %v2822_v42 = vadd.f32 %v2821_v37, %v2820_v30  ;;  %v3788_v47 = vld [vmem:[#allocation2 + $0x11] sm:$0xff] }
 0x18a   : > { %v1467_v48 = vpack.c.bf16 %v3788_v47, %v1451_v17  ;;  %v1547_v31 = vld [vmem:[#allocation2 + $0x12] sm:$0xff] }
 0x18b   : > { %vm1359_vm7 = vcmp.ge.f32.partialorder %v1303_v38, 0.0  ;;  %v1381_v49 = vmul.f32 %v3762_v4, %v1303_v38  ;;  %v1209_v50 = vadd.f32 %v2822_v42, %v3750_v6  ;;  %v1491_v58 = vpack.c.bf16 %v1547_v31, %v1475_v44  ;;  %v3810_v40 = vld [vmem:[#allocation2 + $0x10] sm:$0xff] }
 0x18c   : > { %1651 = vrot.lane.b32.xlu1 %v1467_v48, %s3162_s25 }
 0x18d   : > { %v1397_v20 = vsel %vm1359_vm7, %v1303_v38, %v1381_v49  ;;  %v1306_v39 = vadd.f32 %v2957_v11, %v1209_v50  ;;  %v1548_v54 = vld [vmem:[#allocation2 + $0x22] sm:$0xff] }
 0x18e   : > { %v3802_v21 = vld [vmem:[#allocation2 + $0x21] sm:$0xff]  ;;  %1413 = vst.msk [vmem:[#allocation2 + $0x31] sm:$0xff] %vm4378_vm0, %v1397_v20  ;;  %v2823_v55 = vpop.f32.mrf.mxu0  ;;  %v1563_v57 = vpack.c.bf16 %v1548_v54, %v1547_v31 }
 0x18f   : > { %v1539_v59 = vpack.c.bf16 %v3802_v21, %v3788_v47  ;;  %vm1360_vm8 = vcmp.ge.f32.partialorder %v1306_v39, 0.0  ;;  %v1382_v53 = vmul.f32 %v3762_v4, %v1306_v39  ;;  %v1500_v60 = vld [vmem:[#allocation2 + $0x20] sm:$0xff] }
 0x190   : > { %v2824_v63 = vpop.f32.mrf.mxu0  ;;  %1723 = vrot.lane.b32.xlu0 %v1563_v57, %s3162_s25  ;;  %1675 = vrot.lane.b32.xlu1 %v1491_v58, %s4384_s30  ;;  %v1515_v5 = vpack.c.bf16 %v1500_v60, %v3810_v40 }
 0x191   : > { %v1398_v2 = vsel %vm1360_vm8, %v1306_v39, %v1382_v53  ;;  %v2825_v3 = vadd.f32 %v2824_v63, %v2823_v55  ;;  %vm2415_vm8 = vcmask 1041408  }
 0x192   : > { %1414 = vst.msk [vmem:[#allocation2 + $0x41] sm:$0xff] %vm4378_vm0, %v1398_v2  ;;  %v2826_v56 = vpop.f32.mrf.mxu0 }
 0x193   : > { %v1214_v41 = vadd.f32 %v2825_v3, %v3750_v6 }
 0x194   : > { %v2827_v8 = vpop.f32.mrf.mxu0  ;;  %1699 = vrot.lane.b32.xlu1 %v1515_v5, %s4385_s12 }
 0x195   : > { %v1311_v9 = vadd.f32 %v1310_v62, %v1214_v41  ;;  %v2828_v13 = vadd.f32 %v2827_v8, %v2826_v56  ;;  %v1620_v14 = vld [vmem:[#allocation2 + $0x32] sm:$0xff] }
 0x196   : > { %v1572_v10 = vld [vmem:[#allocation2 + $0x30] sm:$0xff]  ;;  %v1635_v15 = vpack.c.bf16 %v1620_v14, %v1548_v54 }
 0x197   : > { %v3817_v11 = vld [vmem:[#allocation2 + $0x31] sm:$0xff]  ;;  %v3819_v16 = vpack.c.bf16 %v1572_v10, %v1500_v60  ;;  %vm1361_vm9 = vcmp.ge.f32.partialorder %v1311_v9, 0.0  ;;  %v1383_v61 = vmul.f32 %v3762_v4, %v1311_v9  ;;  %v1217_v22 = vadd.f32 %v2828_v13, %v3750_v6 }
 0x198   : > { %v1468_v18 = vpack.c.bf16 %v3817_v11, %v3802_v21  ;;  %2974 = vmatprep.mubr.msk.bf16.mxu0 %vm4378_vm0, %v1635_v15 }
 0x199   : > { %1747 = vrot.lane.b32.xlu0 %v3819_v16, %s4384_s30  ;;  %v1399_v25 = vsel %vm1361_vm9, %v1311_v9, %v1383_v61  ;;  %v1314_v26 = vadd.f32 %v1313_v24, %v1217_v22  ;;  %v3829_v27 = vld [vmem:[#allocation2 + $0x41] sm:$0xff]  ;;  %vm2411_vm9 = vcmask 15360  }
 0x19a   : > { %1653 = vrot.lane.b32.xlu1 %v1468_v18, %s3162_s25  ;;  %1415 = vst.msk [vmem:[#allocation2 + $0x51] sm:$0xff] %vm4378_vm0, %v1399_v25  ;;  %v2829_v28 = vpop.f32.mrf.mxu0  ;;  %v1540_v32 = vpack.c.bf16 %v3829_v27, %v3817_v11  ;;  %v1550_v34 = vld [vmem:[#allocation2 + $0x42] sm:$0xff] }
 0x19b   : > { %vm1362_vm10 = vcmp.ge.f32.partialorder %v1314_v26, 0.0  ;;  %v1384_v33 = vmul.f32 %v3762_v4, %v1314_v26  ;;  %v1502_v12 = vld [vmem:[#allocation2 + $0x40] sm:$0xff]  ;;  %v1564_v17 = vpack.c.bf16 %v1550_v34, %v1620_v14 }
 0x19c   : > { %v2830_v35 = vpop.f32.mrf.mxu0  ;;  %v1516_v0 = vpack.c.bf16 %v1502_v12, %v1572_v10 }
 0x19d   : > { %1771 = vrot.lane.b32.xlu0 %v1468_v18, %s4385_s12  ;;  %v1400_v23 = vsel %vm1362_vm10, %v1314_v26, %v1384_v33  ;;  %v2831_v30 = vadd.f32 %v2830_v35, %v2829_v28 }
 0x19e   : > { %1677 = vrot.lane.b32.xlu1 %v1635_v15, %s4384_s30  ;;  %1416 = vst.msk [vmem:[#allocation2 + $0x61] sm:$0xff] %vm4378_vm0, %v1400_v23  ;;  %v2832_v19 = vpop.f32.mrf.mxu0 }
 0x19f   : > { %v1222_v36 = vadd.f32 %v2831_v30, %v3750_v6 }
 0x1a0   : > { %v2833_v37 = vpop.f32.mrf.mxu0 }
 0x1a1   : > { %1725 = vrot.lane.b32.xlu0 %v1564_v17, %s3162_s25  ;;  %v1319_v38 = vadd.f32 %v3793_v51, %v1222_v36  ;;  %v2834_v42 = vadd.f32 %v2833_v37, %v2832_v19  ;;  %v1622_v48 = vld [vmem:[#allocation2 + $0x52] sm:$0xff]  ;;  %v3853_v51 = vpop.f32.mrf.mxu1 }
 0x1a2   : > { %1701 = vrot.lane.b32.xlu1 %v1516_v0, %s4385_s12  ;;  %v1574_v49 = vld [vmem:[#allocation2 + $0x50] sm:$0xff]  ;;  %v1636_v31 = vpack.c.bf16 %v1622_v48, %v1550_v34 }
 0x1a3   : > { %v3842_v50 = vld [vmem:[#allocation2 + $0x51] sm:$0xff]  ;;  %v3844_v44 = vpack.c.bf16 %v1574_v49, %v1502_v12  ;;  %vm1363_vm11 = vcmp.ge.f32.partialorder %v1319_v38, 0.0  ;;  %v1385_v52 = vmul.f32 %v3762_v4, %v1319_v38  ;;  %v1225_v20 = vadd.f32 %v2834_v42, %v3750_v6  ;;  %v1326_v63 = vpop.f32.mrf.mxu1 }
 0x1a4   : > { %v1469_v29 = vpack.c.bf16 %v3842_v50, %v3829_v27  ;;  %2975 = vmatmul.mubr.msk.bf16.vlgmr.msra.gmra.mxu0 %vm4378_vm0, %v1636_v31 }
 0x1a5   : > { %1749 = vrot.lane.b32.xlu0 %v3844_v44, %s4384_s30  ;;  %v1401_v39 = vsel %vm1363_vm11, %v1319_v38, %v1385_v52  ;;  %v1322_v54 = vadd.f32 %v2961_v7, %v1225_v20  ;;  %v3856_v55 = vld [vmem:[#allocation2 + $0x61] sm:$0xff]  ;;  %v2965_v13 = vpop.f32.mrf.mxu1 }
 0x1a6   : > { %1655 = vrot.lane.b32.xlu1 %v1469_v29, %s3162_s25  ;;  %1417 = vst.msk [vmem:[#allocation2 + $0x71] sm:$0xff] %vm4378_vm0, %v1401_v39  ;;  %v2835_v57 = vpop.f32.mrf.mxu0  ;;  %v1541_v58 = vpack.c.bf16 %v3856_v55, %v3842_v50  ;;  %v1552_v60 = vld [vmem:[#allocation2 + $0x62] sm:$0xff] }
 0x1a7   : > { %vm1364_vm12 = vcmp.ge.f32.partialorder %v1322_v54, 0.0  ;;  %v1386_v53 = vmul.f32 %v3762_v4, %v1322_v54  ;;  %v1504_v2 = vld [vmem:[#allocation2 + $0x60] sm:$0xff]  ;;  %v1565_v41 = vpack.c.bf16 %v1552_v60, %v1622_v48  ;;  %v1329_v33 = vpop.f32.mrf.mxu1 }
 0x1a8   : > { %v2836_v62 = vpop.f32.mrf.mxu0  ;;  %v1517_v8 = vpack.c.bf16 %v1504_v2, %v1574_v49  ;;  %v1459_v52 = vld [vmem:[#allocation2 + $0xa1] sm:$0xff] }
 0x1a9   : > { %1773 = vrot.lane.b32.xlu0 %v1469_v29, %s4385_s12  ;;  %v1402_v3 = vsel %vm1364_vm12, %v1322_v54, %v1386_v53  ;;  %v2837_v56 = vadd.f32 %v2836_v62, %v2835_v57  ;;  %v1578_v29 = vld [vmem:[#allocation2 + $0x90] sm:$0xff] }
 0x1aa   : > { %1679 = vrot.lane.b32.xlu1 %v1636_v31, %s4384_s30  ;;  %1418 = vst.msk [vmem:[#allocation2 + $0x81] sm:$0xff] %vm4378_vm0, %v1402_v3  ;;  %v2838_v5 = vpop.f32.mrf.mxu0  ;;  %v3900_v3 = vpop.f32.mrf.mxu1 }
 0x1ab   : > { %v1230_v7 = vadd.f32 %v2837_v56, %v3750_v6  ;;  %v1483_v56 = vld [vmem:[#allocation2 + $0xa2] sm:$0xff] }
 0x1ac   : > { %v2839_v9 = vpop.f32.mrf.mxu0 }
 0x1ad   : > { %1727 = vrot.lane.b32.xlu0 %v1565_v41, %s3162_s25  ;;  %v1327_v14 = vadd.f32 %v1326_v63, %v1230_v7  ;;  %v2840_v10 = vadd.f32 %v2839_v9, %v2838_v5  ;;  %v1624_v15 = vld [vmem:[#allocation2 + $0x72] sm:$0xff] }
 0x1ae   : > { %1703 = vrot.lane.b32.xlu1 %v1517_v8, %s4385_s12  ;;  %v1576_v18 = vld [vmem:[#allocation2 + $0x70] sm:$0xff]  ;;  %v1637_v22 = vpack.c.bf16 %v1624_v15, %v1552_v60 }
 0x1af   : > { %v3868_v61 = vld [vmem:[#allocation2 + $0x71] sm:$0xff]  ;;  %v3870_v24 = vpack.c.bf16 %v1576_v18, %v1504_v2  ;;  %vm1365_vm13 = vcmp.ge.f32.partialorder %v1327_v14, 0.0  ;;  %v1387_v26 = vmul.f32 %v3762_v4, %v1327_v14  ;;  %v1233_v28 = vadd.f32 %v2840_v10, %v3750_v6 }
 0x1b0   : > { %v1470_v25 = vpack.c.bf16 %v3868_v61, %v3856_v55  ;;  %2978 = vmatprep.mubr.msk.bf16.mxu0 %vm4378_vm0, %v1637_v22  ;;  %v1602_v2 = vld [vmem:[#allocation2 + $0x91] sm:$0xff] }
 0x1b1   : > { %1751 = vrot.lane.b32.xlu0 %v3870_v24, %s4384_s30  ;;  %v1403_v34 = vsel %vm1365_vm13, %v1327_v14, %v1387_v26  ;;  %v1330_v35 = vadd.f32 %v1329_v33, %v1233_v28  ;;  %v1625_v12 = vld [vmem:[#allocation2 + $0x82] sm:$0xff] }
 0x1b2   : > { %1657 = vrot.lane.b32.xlu1 %v1470_v25, %s3162_s25  ;;  %v3880_v23 = vld [vmem:[#allocation2 + $0x81] sm:$0xff]  ;;  %1419 = vst.msk [vmem:[#allocation2 + $0xb1] sm:$0xff] %vm4378_vm0, %v1403_v34  ;;  %v2841_v30 = vpop.f32.mrf.mxu0  ;;  %v1638_v19 = vpack.c.bf16 %v3558_v46, %v1625_v12  ;;  %v1566_v46 = vpack.c.bf16 %v1625_v12, %v1624_v15 }
 0x1b3   : > { %vm1366_vm14 = vcmp.ge.f32.partialorder %v1330_v35, 0.0  ;;  %v1388_v17 = vmul.f32 %v3762_v4, %v1330_v35  ;;  %v1542_v36 = vpack.c.bf16 %v3880_v23, %v3868_v61  ;;  %v1506_v37 = vld [vmem:[#allocation2 + $0x80] sm:$0xff]  ;;  %v1614_v9 = vpack.c.bf16 %v1602_v2, %v3880_v23 }
 0x1b4   : > { %v2842_v0 = vpop.f32.mrf.mxu0  ;;  %2979 = vmatmul.mubr.msk.bf16.gmra.mxu0 %vm4378_vm0, %v1638_v19  ;;  %v1518_v31 = vpack.c.bf16 %v1506_v37, %v1576_v18  ;;  %v1590_v53 = vpack.c.bf16 %v1578_v29, %v1506_v37  ;;  %v1435_v61 = vld [vmem:[#allocation2 + $0xa0] sm:$0xff] }
 0x1b5   : > { %1775 = vrot.lane.b32.xlu0 %v1470_v25, %s4385_s12  ;;  %v1404_v38 = vsel %vm1366_vm14, %v1330_v35, %v1388_v17  ;;  %v2843_v42 = vadd.f32 %v2842_v0, %v2841_v30 }
 0x1b6   : > { %1681 = vrot.lane.b32.xlu1 %v1637_v22, %s4384_s30  ;;  %1420 = vst.msk [vmem:[#allocation2 + $0xc1] sm:$0xff] %vm4378_vm0, %v1404_v38  ;;  %v2844_v48 = vpop.f32.mrf.mxu0  ;;  %v1342_v22 = vpop.f32.mrf.mxu1 }
 0x1b7   : > { %v1238_v49 = vadd.f32 %v2843_v42, %v3750_v6 }
 0x1b8   : > { %v2845_v20 = vpop.f32.mrf.mxu0  ;;  %v2969_v19 = vpop.f32.mrf.mxu1 }
 0x1b9   : > { %1729 = vrot.lane.b32.xlu0 %v1566_v46, %s3162_s25  ;;  %v1335_v39 = vadd.f32 %v3853_v51, %v1238_v49  ;;  %v2846_v54 = vadd.f32 %v2845_v20, %v2844_v48  ;;  %v3895_v57 = vld [vmem:[#allocation2 + $0xb1] sm:$0xff] }
 0x1ba   : > { %1705 = vrot.lane.b32.xlu1 %v1518_v31, %s4385_s12  ;;  %v1471_v60 = vpack.c.bf16 %v3895_v57, %v1459_v52  ;;  %v1484_v51 = vld [vmem:[#allocation2 + $0xb2] sm:$0xff]  ;;  %v1345_v20 = vpop.f32.mrf.mxu1 }
 0x1bb   : > { %vm1367_vm15 = vcmp.ge.f32.partialorder %v1335_v39, 0.0  ;;  %v1389_v62 = vmul.f32 %v3762_v4, %v1335_v39  ;;  %v1241_v63 = vadd.f32 %v2846_v54, %v3750_v6  ;;  %v1495_v15 = vpack.c.bf16 %v1484_v51, %v1483_v56  ;;  %v3914_v35 = vld [vmem:[#allocation2 + $0xb0] sm:$0xff] }
 0x1bd   : > { %1753 = vrot.lane.b32.xlu0 %v1590_v53, %s4384_s30  ;;  %v1405_v5 = vsel %vm1367_vm15, %v1335_v39, %v1389_v62  ;;  %v1338_v41 = vadd.f32 %v2965_v13, %v1241_v63  ;;  %v3904_v7 = vld [vmem:[#allocation2 + $0xc1] sm:$0xff] }
 0x1be   : > { %1659 = vrot.lane.b32.xlu1 %v1471_v60, %s3162_s25  ;;  %1421 = vst.msk [vmem:[#allocation2 + $0xd1] sm:$0xff] %vm4378_vm0, %v1405_v5  ;;  %v2847_v8 = vpop.f32.mrf.mxu0  ;;  %v1543_v14 = vpack.c.bf16 %v3904_v7, %v3895_v57  ;;  %v1556_v18 = vld [vmem:[#allocation2 + $0xc2] sm:$0xff] }
 0x1bf   : > { %vm1368_vm1 = vcmp.ge.f32.partialorder %v1338_v41, 0.0  ;;  %v1390_v10 = vmul.f32 %v3762_v4, %v1338_v41  ;;  %v1508_v13 = vld [vmem:[#allocation2 + $0xc0] sm:$0xff]  ;;  %v1567_v34 = vpack.c.bf16 %v1556_v18, %v1484_v51 }
 0x1c0   : > { %v2848_v25 = vpop.f32.mrf.mxu0  ;;  %v1519_v30 = vpack.c.bf16 %v1508_v13, %v3914_v35 }
 0x1c1   : > { %1777 = vrot.lane.b32.xlu0 %v1614_v9, %s4385_s12  ;;  %v1406_v26 = vsel %vm1368_vm1, %v1338_v41, %v1390_v10  ;;  %v2849_v28 = vadd.f32 %v2848_v25, %v2847_v8 }
 0x1c2   : > { %1683 = vrot.lane.b32.xlu1 %v1495_v15, %s4384_s30  ;;  %1422 = vst.msk [vmem:[#allocation2 + $0xe1] sm:$0xff] %vm4378_vm0, %v1406_v26  ;;  %v2850_v33 = vpop.f32.mrf.mxu0 }
 0x1c3   : > { %v1246_v12 = vadd.f32 %v2849_v28, %v3750_v6 }
 0x1c4   : > { %v2851_v17 = vpop.f32.mrf.mxu0 }
 0x1c5   : > { %1731 = vrot.lane.b32.xlu0 %v1567_v34, %s3162_s25  ;;  %v1343_v0 = vadd.f32 %v1342_v22, %v1246_v12  ;;  %v2852_v37 = vadd.f32 %v2851_v17, %v2850_v33  ;;  %v1628_v38 = vld [vmem:[#allocation2 + $0xd2] sm:$0xff] }
 0x1c6   : > { %1707 = vrot.lane.b32.xlu1 %v1519_v30, %s4385_s12  ;;  %v1580_v42 = vld [vmem:[#allocation2 + $0xd0] sm:$0xff]  ;;  %v1639_v46 = vpack.c.bf16 %v1628_v38, %v1556_v18 }
 0x1c7   : > { %v3920_v48 = vld [vmem:[#allocation2 + $0xd1] sm:$0xff]  ;;  %v3922_v49 = vpack.c.bf16 %v1580_v42, %v1508_v13  ;;  %vm1369_vm2 = vcmp.ge.f32.partialorder %v1343_v0, 0.0  ;;  %v1391_v29 = vmul.f32 %v3762_v4, %v1343_v0  ;;  %v1249_v52 = vadd.f32 %v2852_v37, %v3750_v6 }
 0x1c8   : > { %v1472_v31 = vpack.c.bf16 %v3920_v48, %v3904_v7  ;;  %2982 = vmatprep.mubr.msk.bf16.mxu0 %vm4378_vm0, %v1639_v46 }
 0x1c9   : > { %1755 = vrot.lane.b32.xlu0 %v3922_v49, %s4384_s30  ;;  %v1407_v39 = vsel %vm1369_vm2, %v1343_v0, %v1391_v29  ;;  %v1346_v54 = vadd.f32 %v1345_v20, %v1249_v52  ;;  %v3932_v53 = vld [vmem:[#allocation2 + $0xe1] sm:$0xff] }
 0x1ca   : > { %1661 = vrot.lane.b32.xlu1 %v1472_v31, %s3162_s25  ;;  %1423 = vst.msk [vmem:[#allocation2 + $0xf1] sm:$0xff] %vm4378_vm0, %v1407_v39  ;;  %v2853_v60 = vpop.f32.mrf.mxu0  ;;  %v1544_v62 = vpack.c.bf16 %v3932_v53, %v3920_v48  ;;  %v1558_v2 = vld [vmem:[#allocation2 + $0xe2] sm:$0xff] }
 0x1cb   : > { %vm1370_vm5 = vcmp.ge.f32.partialorder %v1346_v54, 0.0  ;;  %v1392_v63 = vmul.f32 %v3762_v4, %v1346_v54  ;;  %v1510_v51 = vld [vmem:[#allocation2 + $0xe0] sm:$0xff]  ;;  %v1568_v9 = vpack.c.bf16 %v1558_v2, %v1628_v38 }
 0x1cc   : > { %v2854_v56 = vpop.f32.mrf.mxu0  ;;  %v1520_v15 = vpack.c.bf16 %v1510_v51, %v1580_v42 }
 0x1cd   : > { %1779 = vrot.lane.b32.xlu0 %v1472_v31, %s4385_s12  ;;  %v1408_v5 = vsel %vm1370_vm5, %v1346_v54, %v1392_v63  ;;  %v2855_v41 = vadd.f32 %v2854_v56, %v2853_v60 }
 0x1ce   : > { %1685 = vrot.lane.b32.xlu1 %v1639_v46, %s4384_s30  ;;  %1424 = vst.msk [vmem:[#allocation2 + $0x101] sm:$0xff] %vm4378_vm0, %v1408_v5  ;;  %v2856_v8 = vpop.f32.mrf.mxu0 }
 0x1cf   : > { %v1254_v10 = vadd.f32 %v2855_v41, %v3750_v6 }
 0x1d0   : > { %v2857_v18 = vpop.f32.mrf.mxu0 }
 0x1d1   : > { %1733 = vrot.lane.b32.xlu0 %v1568_v9, %s3162_s25  ;;  %v1351_v22 = vadd.f32 %v3900_v3, %v1254_v10  ;;  %v2858_v25 = vadd.f32 %v2857_v18, %v2856_v8  ;;  %v1630_v13 = vld [vmem:[#allocation2 + $0xf2] sm:$0xff] }
 0x1d2   : > { %1709 = vrot.lane.b32.xlu1 %v1520_v15, %s4385_s12  ;;  %v1582_v26 = vld [vmem:[#allocation2 + $0xf0] sm:$0xff]  ;;  %v1640_v33 = vpack.c.bf16 %v1630_v13, %v1558_v2 }
 0x1d3   : > { %v3945_v28 = vld [vmem:[#allocation2 + $0xf1] sm:$0xff]  ;;  %v3947_v34 = vpack.c.bf16 %v1582_v26, %v1510_v51  ;;  %vm1371_vm6 = vcmp.ge.f32.partialorder %v1351_v22, 0.0  ;;  %v1393_v30 = vmul.f32 %v3762_v4, %v1351_v22  ;;  %v1257_v17 = vadd.f32 %v2858_v25, %v3750_v6 }
 0x1d4   : > { %v1473_v12 = vpack.c.bf16 %v3945_v28, %v3932_v53  ;;  %2983 = vmatmul.mubr.msk.bf16.gmra.mxu0 %vm4378_vm0, %v1640_v33  ;;  %v1586_v8 = vld [vmem:[#allocation2 + $0x130] sm:$0xff] }
 0x1d5   : > { %1757 = vrot.lane.b32.xlu0 %v3947_v34, %s4384_s30  ;;  %v1409_v3 = vsel %vm1371_vm6, %v1351_v22, %v1393_v30  ;;  %v1354_v0 = vadd.f32 %v2969_v19, %v1257_v17  ;;  %v3957_v37 = vld [vmem:[#allocation2 + $0x101] sm:$0xff]  ;;  %v1610_v10 = vld [vmem:[#allocation2 + $0x131] sm:$0xff] }
 0x1d6   : > { %1663 = vrot.lane.b32.xlu1 %v1473_v12, %s3162_s25  ;;  %1425 = vst.msk [vmem:[#allocation2 + $0x111] sm:$0xff] %vm4378_vm0, %v1409_v3  ;;  %v1545_v38 = vpack.c.bf16 %v3957_v37, %v3945_v28  ;;  %v1560_v6 = vld [vmem:[#allocation2 + $0x102] sm:$0xff] }
 0x1d7   : > { %vm1372_vm7 = vcmp.ge.f32.partialorder %v1354_v0, 0.0  ;;  %v1394_v42 = vmul.f32 %v3762_v4, %v1354_v0  ;;  %v1512_v46 = vld [vmem:[#allocation2 + $0x100] sm:$0xff]  ;;  %v1569_v19 = vpack.c.bf16 %v1560_v6, %v1630_v13 }
 0x1d8   : > { %v1521_v29 = vpack.c.bf16 %v1512_v46, %v1582_v26  ;;  %v1427_v26 = vld [vmem:[#allocation2] sm:$0xff] }
 0x1d9   : > { %1781 = vrot.lane.b32.xlu0 %v1473_v12, %s4385_s12  ;;  %v1410_v31 = vsel %vm1372_vm7, %v1354_v0, %v1394_v42  ;;  %v1443_v30 = vpack.c.bf16 %v3810_v40, %v1427_v26 }
 0x1da   : > { %1687 = vrot.lane.b32.xlu1 %v1640_v33, %s4384_s30  ;;  %1426 = vst.msk [vmem:[#allocation2 + $0x121] sm:$0xff] %vm4378_vm0, %v1410_v31 }
 0x1dd   : > { %1735 = vrot.lane.b32.xlu0 %v1569_v19, %s3162_s25  ;;  %v1584_v52 = vld [vmem:[#allocation2 + $0x110] sm:$0xff] }
 0x1de   : > { %1711 = vrot.lane.b32.xlu1 %v1521_v29, %s4385_s12  ;;  %v3968_v20 = vld [vmem:[#allocation2 + $0x111] sm:$0xff]  ;;  %v3970_v39 = vpack.c.bf16 %v1584_v52, %v1512_v46 }
 0x1df   : > { %v1474_v4 = vpack.c.bf16 %v3968_v20, %v3957_v37  ;;  %v1490_v54 = vld [vmem:[#allocation2 + $0x112] sm:$0xff] }
 0x1e0   : > { %v3979_v63 = vpack.c.bf16 %v1490_v54, %v1560_v6 }
 0x1e1   : > { %1759 = vrot.lane.b32.xlu0 %v3970_v39, %s4384_s30  ;;  %v3977_v60 = vld [vmem:[#allocation2 + $0x121] sm:$0xff] }
 0x1e2   : > { %1665 = vrot.lane.b32.xlu1 %v1474_v4, %s3162_s25  ;;  %v3981_v2 = vld [vmem:[#allocation2 + $0x122] sm:$0xff]  ;;  %v1546_v56 = vpack.c.bf16 %v3977_v60, %v3968_v20  ;;  %v1618_v15 = vpack.c.bf16 %v1610_v10, %v3977_v60  ;;  %v1634_v20 = vld [vmem:[#allocation2 + $0x132] sm:$0xff] }
 0x1e3   : > { %v1514_v51 = vld [vmem:[#allocation2 + $0x120] sm:$0xff]  ;;  %v1570_v5 = vpack.c.bf16 %v3981_v2, %v1490_v54  ;;  %v1642_v60 = vpack.c.bf16 %v1634_v20, %v3981_v2 }
 0x1e4   : > { %v1522_v41 = vpack.c.bf16 %v1514_v51, %v1584_v52  ;;  %v1594_v9 = vpack.c.bf16 %v1586_v8, %v1514_v51  ;;  %v2329_v2 = vld [vmem:[%s4371_s8] sm:$0xff] }
 0x1e5   : > { %1783 = vrot.lane.b32.xlu0 %v1474_v4, %s4385_s12 }
 0x1e6   : > { %1689 = vrot.lane.b32.xlu1 %v3979_v63, %s4384_s30 }
 0x1e9   : > { %1737 = vrot.lane.b32.xlu0 %v1570_v5, %s3162_s25  ;;  %s3166_s25 = smov [#allocation3]  }
 0x1ea   : > { %1713 = vrot.lane.b32.xlu1 %v1522_v41, %s4385_s12 }
 0x1ed   : > { %1761 = vrot.lane.b32.xlu0 %v1594_v9, %s4384_s30  ;;  %s4323_s30 = scalar_lea.sflag [#allocation4], %s353_s26 }
 0x1f1   : > { %1785 = vrot.lane.b32.xlu0 %v1618_v15, %s4385_s12 }
 0x1fe   : > { %v1652_v18 = vpop.permute.xlu1 %1651 }
 0x1ff   : > { %v1789_v3 = vsel %vm4378_vm0, %v1443_v30, %v1652_v18 }
 0x202   : > { %v1676_v22 = vpop.permute.xlu1 %1675  ;;  %v1724_v25 = vpop.permute.xlu0 %1723 }
 0x203   : > { %v1853_v17 = vsel %vm4378_vm0, %v1539_v59, %v1724_v25  ;;  %v1812_v6 = vsel %vm882_vm3, %v1789_v3, %v1676_v22 }
 0x206   : > { %v1700_v13 = vpop.permute.xlu1 %1699 }
 0x207   : > { %v1828_v19 = vsel %vm899_vm4, %v1812_v6, %v1700_v13 }
 0x20b   : > { %v1748_v33 = vpop.permute.xlu0 %1747 }
 0x20c   : > { %v1654_v12 = vpop.permute.xlu1 %1653  ;;  %v1876_v0 = vsel %vm882_vm3, %v1853_v17, %v1748_v33 }
 0x20d   : > { %v1792_v52 = vsel %vm4378_vm0, %v3819_v16, %v1654_v12 }
 0x20f   : > { %v1772_v42 = vpop.permute.xlu0 %1771 }
 0x210   : > { %v1678_v46 = vpop.permute.xlu1 %1677  ;;  %v1892_v31 = vsel %vm899_vm4, %v1876_v0, %v1772_v42 }
 0x211   : > { %2122 = vmatprep.mubr.bf16.mxu1 %v1892_v31  ;;  %v1814_v54 = vsel %vm882_vm3, %v1792_v52, %v1678_v46  ;;  %v1447_v46 = vpack.c.bf16 %v3914_v35, %v1435_v61 }
 0x212   : > { %2123 = vmatmul.mubr.bf16.vlgmr.msra.gmra.mxu1 %v1828_v19 }
 0x213   : > { %v1726_v40 = vpop.permute.xlu0 %1725  ;;  %3008 = vmatpush3.bf16.msra.mxu1 %v3718_v45 }
 0x214   : > { %v1702_v47 = vpop.permute.xlu1 %1701  ;;  %3007 = vmatprep.subr.bf16.mxu1 %v3725_v43  ;;  %v1856_v29 = vsel %vm4378_vm0, %v1540_v32, %v1726_v40 }
 0x217   : > { %v1750_v21 = vpop.permute.xlu0 %1749  ;;  %3009 = vmatpush3.bf16.msra.mxu1 %v3725_v43  ;;  %v1831_v43 = vsel %vm899_vm4, %v1814_v54, %v1702_v47 }
 0x218   : > { %v1656_v59 = vpop.permute.xlu1 %1655  ;;  %2990 = vmatprep.subr.mxu1 %v3160_v1  ;;  %v1878_v4 = vsel %vm882_vm3, %v1856_v29, %v1750_v21 }
 0x219   : > { %v1795_v32 = vsel %vm4378_vm0, %v3844_v44, %v1656_v59 }
 0x21b   : > { %v1774_v45 = vpop.permute.xlu0 %1773 }
 0x21c   : > { %v1680_v51 = vpop.permute.xlu1 %1679  ;;  %v1895_v5 = vsel %vm899_vm4, %v1878_v4, %v1774_v45 }
 0x21d   : > { %2130 = vmatprep.mubr.bf16.mxu1 %v1895_v5  ;;  %v1816_v15 = vsel %vm882_vm3, %v1795_v32, %v1680_v51 }
 0x21e   : > { %2131 = vmatmul.mubr.bf16.gmra.mxu1 %v1831_v43 }
 0x21f   : > { %v1728_v41 = vpop.permute.xlu0 %1727 }
 0x220   : > { %v1704_v8 = vpop.permute.xlu1 %1703  ;;  %v1859_v16 = vsel %vm4378_vm0, %v1541_v58, %v1728_v41 }
 0x221   : > { %v1834_v25 = vsel %vm899_vm4, %v1816_v15, %v1704_v8 }
 0x223   : > { %v1752_v11 = vpop.permute.xlu0 %1751 }
 0x224   : > { %v1658_v27 = vpop.permute.xlu1 %1657  ;;  %v1880_v9 = vsel %vm882_vm3, %v1859_v16, %v1752_v11 }
 0x225   : > { %v1798_v58 = vsel %vm4378_vm0, %v3870_v24, %v1658_v27 }
 0x227   : > { %v1776_v10 = vpop.permute.xlu0 %1775 }
 0x228   : > { %v1682_v18 = vpop.permute.xlu1 %1681  ;;  %v1898_v22 = vsel %vm899_vm4, %v1880_v9, %v1776_v10 }
 0x229   : > { %2138 = vmatprep.mubr.bf16.mxu1 %v1898_v22  ;;  %v1818_v30 = vsel %vm882_vm3, %v1798_v58, %v1682_v18 }
 0x22a   : > { %2139 = vmatmul.mubr.bf16.gmra.mxu1 %v1834_v25 }
 0x22b   : > { %v1730_v13 = vpop.permute.xlu0 %1729 }
 0x22c   : > { %v1706_v26 = vpop.permute.xlu1 %1705  ;;  %v1862_v44 = vsel %vm4378_vm0, %v1542_v36, %v1730_v13 }
 0x22d   : > { %v1837_v0 = vsel %vm899_vm4, %v1818_v30, %v1706_v26 }
 0x22f   : > { %v1754_v50 = vpop.permute.xlu0 %1753 }
 0x230   : > { %v1660_v55 = vpop.permute.xlu1 %1659  ;;  %v1882_v33 = vsel %vm882_vm3, %v1862_v44, %v1754_v50 }
 0x231   : > { %v1801_v31 = vsel %vm4378_vm0, %v1447_v46, %v1660_v55 }
 0x233   : > { %v1778_v12 = vpop.permute.xlu0 %1777 }
 0x234   : > { %v1684_v17 = vpop.permute.xlu1 %1683  ;;  %v1901_v3 = vsel %vm899_vm4, %v1882_v33, %v1778_v12 }
 0x235   : > { %2146 = vmatprep.mubr.bf16.mxu1 %v1901_v3  ;;  %v1820_v47 = vsel %vm882_vm3, %v1801_v31, %v1684_v17 }
 0x236   : > { %2147 = vmatmul.mubr.bf16.gmra.mxu1 %v1837_v0 }
 0x237   : > { %v1732_v42 = vpop.permute.xlu0 %1731 }
 0x238   : > { %v1708_v6 = vpop.permute.xlu1 %1707  ;;  %v1865_v24 = vsel %vm4378_vm0, %v1543_v14, %v1732_v42 }
 0x239   : > { %v1840_v29 = vsel %vm899_vm4, %v1820_v47, %v1708_v6 }
 0x23b   : > { %v1756_v23 = vpop.permute.xlu0 %1755 }
 0x23c   : > { %v1662_v36 = vpop.permute.xlu1 %1661  ;;  %v1884_v19 = vsel %vm882_vm3, %v1865_v24, %v1756_v23 }
 0x23d   : > { %v1804_v14 = vsel %vm4378_vm0, %v3922_v49, %v1662_v36 }
 0x23f   : > { %v1780_v40 = vpop.permute.xlu0 %1779 }
 0x240   : > { %v1686_v21 = vpop.permute.xlu1 %1685  ;;  %v1904_v59 = vsel %vm899_vm4, %v1884_v19, %v1780_v40 }
 0x241   : > { %2154 = vmatprep.mubr.bf16.mxu1 %v1904_v59  ;;  %v1822_v51 = vsel %vm882_vm3, %v1804_v14, %v1686_v21 }
 0x242   : > { %2155 = vmatmul.mubr.bf16.gmra.mxu1 %v1840_v29 }
 0x243   : > { %v1734_v35 = vpop.permute.xlu0 %1733 }
 0x244   : > { %v1710_v52 = vpop.permute.xlu1 %1709  ;;  %v1868_v7 = vsel %vm4378_vm0, %v1544_v62, %v1734_v35 }
 0x245   : > { %v1843_v41 = vsel %vm899_vm4, %v1822_v51, %v1710_v52  ;;  %v4103_v51 = vld [vmem:[%s4369_s6] ss:$0 sm:$0xff] }
 0x247   : > { %v1758_v4 = vpop.permute.xlu0 %1757 }
 0x248   : > { %v1664_v57 = vpop.permute.xlu1 %1663  ;;  %v1886_v45 = vsel %vm882_vm3, %v1868_v7, %v1758_v4 }
 0x249   : > { %v1807_v62 = vsel %vm4378_vm0, %v3947_v34, %v1664_v57 }
 0x24b   : > { %v1782_v54 = vpop.permute.xlu0 %1781 }
 0x24c   : > { %v1688_v5 = vpop.permute.xlu1 %1687  ;;  %v1907_v43 = vsel %vm899_vm4, %v1886_v45, %v1782_v54 }
 0x24d   : > { %2162 = vmatprep.mubr.bf16.mxu1 %v1907_v43  ;;  %v1824_v32 = vsel %vm882_vm3, %v1807_v62, %v1688_v5 }
 0x24e   : > { %2163 = vmatmul.mubr.bf16.gmra.mxu1 %v1843_v41 }
 0x24f   : > { %v1736_v8 = vpop.permute.xlu0 %1735 }
 0x250   : > { %v1712_v11 = vpop.permute.xlu1 %1711  ;;  %v1871_v49 = vsel %vm4378_vm0, %v1545_v38, %v1736_v8 }
 0x251   : > { %v1846_v10 = vsel %vm899_vm4, %v1824_v32, %v1712_v11 }
 0x253   : > { %v1760_v48 = vpop.permute.xlu0 %1759 }
 0x254   : > { %v1666_v53 = vpop.permute.xlu1 %1665  ;;  %v1888_v27 = vsel %vm882_vm3, %v1871_v49, %v1760_v48 }
 0x255   : > { %v1810_v38 = vsel %vm4378_vm0, %v3970_v39, %v1666_v53  ;;  %v2332_v39 = vld [vmem:[%s4371_s8 + $0x18] sm:$0xff] }
 0x257   : > { %v1784_v16 = vpop.permute.xlu0 %1783 }
 0x258   : > { %v1910_v9 = vsel %vm899_vm4, %v1888_v27, %v1784_v16  ;;  %v1690_v18 = vpop.permute.xlu1 %1689 }
 0x259   : > { %2170 = vmatprep.mubr.bf16.mxu1 %v1910_v9  ;;  %v1826_v13 = vsel %vm882_vm3, %v1810_v38, %v1690_v18 }
 0x25a   : > { %2171 = vmatmul.mubr.bf16.gmra.mxu1 %v1846_v10 }
 0x25b   : > { %v1738_v15 = vpop.permute.xlu0 %1737 }
 0x25c   : > { %v1874_v37 = vsel %vm4378_vm0, %v1546_v56, %v1738_v15  ;;  %v1714_v34 = vpop.permute.xlu1 %1713  ;;  %v2331_v56 = vld [vmem:[%s4371_s8 + $0x10] sm:$0xff] }
 0x25d   : > { %v1849_v50 = vsel %vm899_vm4, %v1826_v13, %v1714_v34 }
 0x25f   : > { %v1762_v28 = vpop.permute.xlu0 %1761 }
 0x260   : > { %v1890_v22 = vsel %vm882_vm3, %v1874_v37, %v1762_v28  ;;  %vm3164_vm3 = vmmov 0  }
 0x263   : > { %v1786_v25 = vpop.permute.xlu0 %1785 }
 0x264   : > { %v1913_v26 = vsel %vm899_vm4, %v1890_v22, %v1786_v25  ;;  %v2976_v24 = vpop.f32.mrf.mxu0  ;;  %vm2335_vm4 = vcmask 1041409  }
 0x265   : > { %2178 = vmatprep.mubr.bf16.mxu1 %v1913_v26 }
 0x266   : > { %2179 = vmatmul.mubr.bf16.gmra.mxu1 %v1849_v50  ;;  %v2221_v40 = vpop.f32.mrf.mxu0 }
 0x267   : > { %2986 = vmatprep.mubr.msk.bf16.mxu1 %vm4378_vm0, %v3979_v63  ;;  %v2330_v63 = vld [vmem:[%s4371_s8 + $0x8] sm:$0xff] }
 0x268   : > { %v2977_v21 = vpop.f32.mrf.mxu0 }
 0x26a   : > { %v2224_v29 = vpop.f32.mrf.mxu0 }
 0x26e   : > { %2987 = vmatmul.mubr.msk.bf16.vlgmr.msra.gmra.mxu1 %vm4378_vm0, %v1642_v60 }
 0x26f   : > { %2991 = vmatpush3.msra.mxu1 %v2332_v39  ;;  %2998 = vmatprep.mubr.msk.f32.mxu1 %vm3164_vm3, %v3160_v1 }
 0x270   : > { %2992 = vmatprep.subr.mxu1 %v3160_v1 }
 0x271   : > { %2993 = vmatpush3.msra.mxu1 %v2331_v56 }
 0x272   : > { %2994 = vmatprep.subr.mxu1 %v3160_v1 }
 0x273   : > { %2995 = vmatpush3.msra.mxu1 %v2330_v63 }
 0x274   : > { %2996 = vmatprep.subr.mxu1 %v3160_v1  ;;  %v2980_v52 = vpop.f32.mrf.mxu0 }
 0x275   : > { %2997 = vmatpush3.msra.mxu1 %v2329_v2 }
 0x276   : > { %3001 = vmatprep.subr.mxu1 %v3160_v1  ;;  %v2237_v7 = vpop.f32.mrf.mxu0 }
 0x278   : > { %v2981_v43 = vpop.f32.mrf.mxu0 }
 0x27a   : > { %v2240_v62 = vpop.f32.mrf.mxu0 }
 0x294   : > { %v2984_v10 = vpop.f32.mrf.mxu0 }
 0x296   : > { %v2253_v26 = vpop.f32.mrf.mxu0 }
 0x2d2   : > { %v2885_v55 = vpop.f32.mrf.mxu1 }
 0x2d4   : > { %v2886_v44 = vpop.f32.mrf.mxu1 }
 0x2d5   : > { %v2887_v45 = vadd.f32 %v2886_v44, %v2885_v55 }
 0x2d6   : > { %v2888_v58 = vpop.f32.mrf.mxu1 }
 0x2d7   : > { %v2125_v11 = vadd.f32 %v2887_v45, %v4103_v51 }
 0x2d8   : > { %v2889_v33 = vpop.f32.mrf.mxu1 }
 0x2d9   : > { %v2890_v14 = vadd.f32 %v2889_v33, %v2888_v58  ;;  %v4111_v15 = vadd.f32 %v2221_v40, %v2125_v11 }
 0x2db   : > { %v2128_v41 = vadd.f32 %v2890_v14, %v4103_v51  ;;  %v2284_v50 = vsel %vm4378_vm0, %v4111_v15, 0.0 }
 0x2dd   : > { %v4108_v16 = vadd.f32 %v2224_v29, %v2128_v41 }
 0x2de   : > { %v2891_v12 = vpop.f32.mrf.mxu1 }
 0x2df   : > { %v2285_v38 = vsel %vm4378_vm0, %v4108_v16, 0.0 }
 0x2e0   : > { %v2892_v30 = vpop.f32.mrf.mxu1  ;;  %v2286_v2 = vadd.f32 %v2285_v38, %v2284_v50 }
 0x2e1   : > { %v2893_v5 = vadd.f32 %v2892_v30, %v2891_v12  ;;  %v2985_v30 = vpop.f32.mrf.mxu0 }
 0x2e2   : > { %v2894_v17 = vpop.f32.mrf.mxu1 }
 0x2e3   : > { %v2133_v49 = vadd.f32 %v2893_v5, %v4103_v51  ;;  %v2256_v40 = vpop.f32.mrf.mxu0 }
 0x2e4   : > { %v2895_v3 = vpop.f32.mrf.mxu1 }
 0x2e5   : > { %v2896_v8 = vadd.f32 %v2895_v3, %v2894_v17  ;;  %v4113_v28 = vadd.f32 %v2976_v24, %v2133_v49 }
 0x2e7   : > { %v2136_v32 = vadd.f32 %v2896_v8, %v4103_v51  ;;  %v2287_v60 = vsel %vm4378_vm0, %v4113_v28, 0.0 }
 0x2e8   : > { %v2288_v17 = vadd.f32 %v2287_v60, %v2286_v2 }
 0x2e9   : > { %v4118_v22 = vadd.f32 %v2977_v21, %v2136_v32 }
 0x2ea   : > { %v2897_v0 = vpop.f32.mrf.mxu1 }
 0x2eb   : > { %v2289_v44 = vsel %vm4378_vm0, %v4118_v22, 0.0 }
 0x2ec   : > { %v2898_v42 = vpop.f32.mrf.mxu1 }
 0x2ed   : > { %v2899_v53 = vadd.f32 %v2898_v42, %v2897_v0 }
 0x2ee   : > { %v2900_v6 = vpop.f32.mrf.mxu1 }
 0x2ef   : > { %v2141_v37 = vadd.f32 %v2899_v53, %v4103_v51 }
 0x2f0   : > { %v2901_v61 = vpop.f32.mrf.mxu1 }
 0x2f1   : > { %v2902_v9 = vadd.f32 %v2901_v61, %v2900_v6  ;;  %v4125_v39 = vadd.f32 %v2237_v7, %v2141_v37 }
 0x2f3   : > { %v2144_v25 = vadd.f32 %v2902_v9, %v4103_v51  ;;  %v2291_v0 = vsel %vm4378_vm0, %v4125_v39, 0.0 }
 0x2f5   : > { %v4130_v58 = vadd.f32 %v2240_v62, %v2144_v25 }
 0x2f6   : > { %v2903_v23 = vpop.f32.mrf.mxu1 }
 0x2f7   : > { %v2293_v24 = vsel %vm4378_vm0, %v4130_v58, 0.0 }
 0x2f8   : > { %v2904_v36 = vpop.f32.mrf.mxu1 }
 0x2f9   : > { %v2905_v34 = vadd.f32 %v2904_v36, %v2903_v23  ;;  %v2290_v23 = vadd.f32 %v2289_v44, %v2288_v17 }
 0x2fa   : > { %v2906_v46 = vpop.f32.mrf.mxu1 }
 0x2fb   : > { %v2149_v56 = vadd.f32 %v2905_v34, %v4103_v51 }
 0x2fc   : > { %v2907_v31 = vpop.f32.mrf.mxu1 }
 0x2fd   : > { %v2908_v13 = vadd.f32 %v2907_v31, %v2906_v46  ;;  %v4135_v42 = vadd.f32 %v2980_v52, %v2149_v56 }
 0x2ff   : > { %v2152_v33 = vadd.f32 %v2908_v13, %v4103_v51 }
 0x301   : > { %v4141_v31 = vadd.f32 %v2981_v43, %v2152_v33 }
 0x302   : > { %v2909_v19 = vpop.f32.mrf.mxu1 }
 0x303   : > { %v2297_v7 = vsel %vm4378_vm0, %v4141_v31, 0.0 }
 0x304   : > { %v2910_v47 = vpop.f32.mrf.mxu1 }
 0x305   : > { %v2911_v55 = vadd.f32 %v2910_v47, %v2909_v19  ;;  %v2292_v47 = vadd.f32 %v2291_v0, %v2290_v23 }
 0x306   : > { %v2912_v59 = vpop.f32.mrf.mxu1 }
 0x307   : > { %v2157_v36 = vadd.f32 %v2911_v55, %v4103_v51  ;;  %v2294_v52 = vadd.f32 %v2293_v24, %v2292_v47 }
 0x308   : > { %v2913_v35 = vpop.f32.mrf.mxu1 }
 0x309   : > { %v2914_v63 = vadd.f32 %v2913_v35, %v2912_v59  ;;  %v2295_v59 = vsel %vm4378_vm0, %v4135_v42, 0.0 }
 0x30b   : > { %v2160_v6 = vadd.f32 %v2914_v63, %v4103_v51 }
 0x30d   : > { %v4146_v29 = vadd.f32 %v2256_v40, %v2160_v6 }
 0x30e   : > { %v2915_v4 = vpop.f32.mrf.mxu1 }
 0x30f   : > { %v2306_v43 = vsel %vm4378_vm0, %v4146_v29, 0.0 }
 0x310   : > { %v2916_v57 = vpop.f32.mrf.mxu1 }
 0x311   : > { %v2917_v12 = vadd.f32 %v2916_v57, %v2915_v4  ;;  %v4149_v4 = vadd.f32 %v2253_v26, %v2157_v36 }
 0x312   : > { %v2918_v54 = vpop.f32.mrf.mxu1 }
 0x313   : > { %v2165_v19 = vadd.f32 %v2917_v12, %v4103_v51  ;;  %v2305_v11 = vsel %vm4378_vm0, %v4149_v4, 0.0 }
 0x314   : > { %v2919_v48 = vpop.f32.mrf.mxu1 }
 0x315   : > { %v2920_v61 = vadd.f32 %v2919_v48, %v2918_v54  ;;  %v4153_v14 = vadd.f32 %v2984_v10, %v2165_v19  ;;  %v2296_v54 = vadd.f32 %v2295_v59, %v2294_v52  ;;  %v2410_v52 = vld [vmem:[%s4372_s9] sm:$0x3] }
 0x317   : > { %v2168_v35 = vadd.f32 %v2920_v61, %v4103_v51  ;;  %v2298_v8 = vadd.f32 %v2297_v7, %v2296_v54  ;;  %v2308_v49 = vsel %vm4378_vm0, %v4153_v14, 0.0 }
 0x319   : > { %v4157_v41 = vadd.f32 %v2985_v30, %v2168_v35  ;;  %v2299_v34 = vrot.slane %v2298_v8, 4 }
 0x31a   : > { %v2921_v27 = vpop.f32.mrf.mxu1 }
 0x31b   : > { %v2310_v37 = vsel %vm4378_vm0, %v4157_v41, 0.0  ;;  %v2300_v55 = vadd.f32 %v2299_v34, %v2298_v8 }
 0x31c   : > { %v2922_v18 = vpop.f32.mrf.mxu1 }
 0x31d   : > { %v2923_v45 = vadd.f32 %v2922_v18, %v2921_v27  ;;  %v2307_v27 = vadd.f32 %v2306_v43, %v2305_v11 }
 0x31e   : > { %v2924_v20 = vpop.f32.mrf.mxu1 }
 0x31f   : > { %v2173_v32 = vadd.f32 %v2923_v45, %v4103_v51  ;;  %v2309_v38 = vadd.f32 %v2308_v49, %v2307_v27  ;;  %v3165_v49 = vmov 1966171168  }
 0x320   : > { %v2925_v3 = vpop.f32.mrf.mxu1 }
 0x321   : > { %v2926_v53 = vadd.f32 %v2925_v3, %v2924_v20  ;;  %v2311_v20 = vadd.f32 %v2310_v37, %v2309_v38  ;;  %v2301_v3 = vrot.slane %v2300_v55, 2 }
 0x323   : > { %v2176_v50 = vadd.f32 %v2926_v53, %v4103_v51  ;;  %v2513_v53 = vunpack.c.l.s4 %v3165_v49 }
 0x326   : > { %v2927_v46 = vpop.f32.mrf.mxu1 }
 0x328   : > { %v2928_v21 = vpop.f32.mrf.mxu1 }
 0x329   : > { %v2929_v62 = vadd.f32 %v2928_v21, %v2927_v46 }
 0x32a   : > { %v2930_v57 = vpop.f32.mrf.mxu1 }
 0x32b   : > { %v2181_v13 = vadd.f32 %v2929_v62, %v4103_v51  ;;  %v2515_v62 = vlaneseq }
 0x32c   : > { %v2931_v5 = vpop.f32.mrf.mxu1 }
 0x32d   : > { %v2932_v10 = vadd.f32 %v2931_v5, %v2930_v57 }
 0x32e   : > { %v2988_v48 = vpop.f32.mrf.mxu1 }
 0x32f   : > { %v4172_v56 = vadd.f32 %v2988_v48, %v2181_v13  ;;  %v2184_v63 = vadd.f32 %v2932_v10, %v4103_v51  ;;  %v2302_v51 = vadd.f32 %v2301_v3, %v2300_v55 }
 0x330   : > { %v2269_v9 = vpop.f32.mrf.mxu1 }
 0x331   : > { %v4164_v18 = vadd.f32 %v2269_v9, %v2173_v32  ;;  %v2316_v17 = vsel %vm4378_vm0, %v4172_v56, 0.0  ;;  %v2303_v24 = vrot.slane %v2302_v51, 1  ;;  %v2514_v32 = vunpack.c.0.s8 %v2513_v53 }
 0x332   : > { %v2989_v25 = vpop.f32.mrf.mxu1 }
 0x333   : > { %v2312_v26 = vsel %vm4378_vm0, %v4164_v18, 0.0  ;;  %v4177_v33 = vadd.f32 %v2989_v25, %v2184_v63  ;;  %v2304_v40 = vadd.f32 %v2303_v24, %v2302_v51  ;;  %v2503_v51 = vld [vmem:[%s3404_s11 + $0x40] sm:$0xff] }
 0x334   : > { %v2272_v60 = vpop.f32.mrf.mxu1  ;;  %v2313_v44 = vadd.f32 %v2312_v26, %v2311_v20  ;;  %v2495_v26 = vld [vmem:[%s3404_s11] sm:$0xff]  ;;  %v2497_v20 = vld [vmem:[%s3404_s11 + $0x10] sm:$0xff] }
 0x335   : > { %v4175_v2 = vadd.f32 %v2272_v60, %v2176_v50  ;;  %v2318_v6 = vsel %vm4378_vm0, %v4177_v33, 0.0  ;;  %v2327_v59 = vmul.f32 0.015625, %v2304_v40  ;;  %v2496_v50 = vld [vmem:[%s3404_s11 + $0x8] sm:$0xff] }
 0x337   : > { %v2314_v12 = vsel %vm4378_vm0, %v4175_v2, 0.0 }
 0x338   : > { %v2315_v30 = vadd.f32 %v2314_v12, %v2313_v44  ;;  %v2498_v12 = vld [vmem:[%s3404_s11 + $0x18] sm:$0xff] }
 0x33a   : > { %v2317_v0 = vadd.f32 %v2316_v17, %v2315_v30  ;;  %v2499_v30 = vld [vmem:[%s3404_s11 + $0x20] sm:$0xff]  ;;  %v2500_v17 = vld [vmem:[%s3404_s11 + $0x28] sm:$0xff] }
 0x33c   : > { %v2319_v61 = vadd.f32 %v2318_v6, %v2317_v0 }
 0x33e   : > { %v2320_v23 = vrot.slane %v2319_v61, 4 }
 0x340   : > { %v2321_v36 = vadd.f32 %v2320_v23, %v2319_v61 }
 0x342   : > { %v2322_v46 = vrot.slane %v2321_v36, 2 }
 0x344   : > { %v2323_v19 = vadd.f32 %v2322_v46, %v2321_v36  ;;  %v2505_v46 = vld [vmem:[%s3404_s11 + $0x50] sm:$0xff] }
 0x346   : > { %v2324_v47 = vrot.slane %v2323_v19, 1 }
 0x348   : > { %v2325_v21 = vadd.f32 %v2324_v47, %v2323_v19  ;;  %v2508_v47 = vld [vmem:[%s3404_s11 + $0x68] sm:$0xff] }
 0x34a   : > { %v2328_v35 = vmul.f32 0.015625, %v2325_v21 }
 0x34c   : > { %v2336_v57 = vsel %vm2335_vm4, %v2328_v35, %v2327_v59  ;;  %v2510_v35 = vld [vmem:[%s3404_s11 + $0x78] sm:$0xff] }
 0x34d   : > { %2999 = vmatmul.mubr.msk.f32.vlgmr.msra.gmra.mxu1 %vm4378_vm0, %v2336_v57  ;;  %vm4386_vm0 = vcmask 261120  }
 0x34e   : > { %3002 = vmatpush3.msk.msra.mxu1 %vm2415_vm8, %v2410_v52  ;;  %3003 = vmatprep.mubr.msk.f32.mxu1 %vm3164_vm3, %v3160_v1  ;;  %v2516_v1 = vshrl.u32 %v2515_v62, 7  ;;  %vm4388_vm8 = vmmov %vm4386_vm0 }
 0x350   : > { %v2517_v27 = vsub.s32 %v2514_v32, %v2516_v1  ;;  %v2536_v37 = vsub.s32 0, %v2516_v1 }
 0x40d   : > { %v2405_v7 = vpop.f32.mrf.mxu1 }
 0x40e   : > { %v2409_v45 = vmax.f32 %v2405_v7, 0.0 }
 0x40f   : > { %v3000_v54 = vpop.f32.mrf.mxu1 }
 0x410   : > { %3004 = vmatmul.mubr.msk.f32.vlgmr.msra.gmra.mxu1 %vm2411_vm9, %v2409_v45  ;;  %vm4387_vm9 = vmmov %vm4386_vm0 }
 0x4d0   : > { %v2485_v5 = vpop.f32.mrf.mxu1 }
 0x4d1   : > { %v2785_v43 = vmul.f32 -1.442695, %v2485_v5 }
 0x4d2   : > { %v3005_v8 = vpop.f32.mrf.mxu1 }
 0x4d3   : > { %3093 = vpow2.f32 %v2785_v43 }
 0x4e0   : > { %v3094_v11 = vpop.eup %3093 }
 0x4e1   : > { %v2492_v48 = vadd.f32 1.0, %v3094_v11  ;;  %v3097_v11 = vld [vmem:[%s4370_s7] ss:$0 sm:$0xff] }
 0x4e3   : > { %3095 = vrcp.f32 %v2492_v48 }
 0x4f0   : > { %v3096_v9 = vpop.eup %3095 }
 0x4f1   : > { %v2518_v10 = vrot.slane %v3096_v9, %v2517_v27 }
 0x4f3   : > { %v2519_v34 = vcombine.high %v2518_v10, %v2518_v10  ;;  %v2526_v38 = vrot.slane %v2518_v10, %v2517_v27 }
 0x4f5   : > { %v2533_v25 = vrot.slane %v2519_v34, %v2517_v27  ;;  %v2537_v13 = vrot.slane %v2526_v38, %v2536_v37 }
 0x4f7   : > { %v2541_v60 = vrot.slane %v2533_v25, %v2536_v37  ;;  %v2544_v63 = vmul.f32 %v2537_v13, %v4111_v15  ;;  %v2545_v55 = vmul.f32 %v2537_v13, %v4108_v16  ;;  %v2546_v44 = vmul.f32 %v2537_v13, %v4113_v28  ;;  %v2501_v15 = vld [vmem:[%s3404_s11 + $0x30] sm:$0xff]  ;;  %v2502_v16 = vld [vmem:[%s3404_s11 + $0x38] sm:$0xff] }
 0x4f8   : > { %v2547_v3 = vmul.f32 %v2537_v13, %v4118_v22  ;;  %v2548_v0 = vmul.f32 %v2537_v13, %v4125_v39  ;;  %v2549_v6 = vmul.f32 %v2537_v13, %v4130_v58  ;;  %v2550_v61 = vmul.f32 %v2537_v13, %v4135_v42  ;;  %v2504_v39 = vld [vmem:[%s3404_s11 + $0x48] sm:$0xff]  ;;  %v2506_v58 = vld [vmem:[%s3404_s11 + $0x58] sm:$0xff] }
 0x4f9   : > { %v2551_v28 = vmul.f32 %v2537_v13, %v4141_v31  ;;  %v2552_v23 = vmul.f32 %v2541_v60, %v4149_v4  ;;  %v2553_v36 = vmul.f32 %v2541_v60, %v4146_v29  ;;  %v2554_v22 = vmul.f32 %v2541_v60, %v4153_v14  ;;  %v2507_v31 = vld [vmem:[%s3404_s11 + $0x60] sm:$0xff]  ;;  %v2509_v4 = vld [vmem:[%s3404_s11 + $0x70] sm:$0xff]  ;;  %s4236_s11 = sshll.u32 %s353_s26, 7 }
 0x4fa   : > { %v2555_v24 = vmul.f32 %v2541_v60, %v4157_v41  ;;  %v2556_v42 = vmul.f32 %v2541_v60, %v4164_v18  ;;  %v2557_v19 = vmul.f32 %v2541_v60, %v4175_v2  ;;  %v2558_v40 = vmul.f32 %v2541_v60, %v4172_v56  ;;  %s4252_s3 = scalar_lea.vmem [#allocation3], %s4236_s11  ;;  %s3102_s11 = sshll.u32 %s3166_s25, 4  ;;  %s3103_s11 = int_to_ptr.vmem [resolvable:$false] %s3102_s11 }
 0x4fb   : > { %v2559_v29 = vmul.f32 %v2541_v60, %v4177_v33  ;;  %v2560_v21 = vadd.f32 %v2544_v63, %v2495_v26  ;;  %v2561_v59 = vadd.f32 %v2545_v55, %v2496_v50  ;;  %v2562_v14 = vadd.f32 %v2546_v44, %v2497_v20  ;;  %s2655_s18 = sshll.u32 %s4252_s3, 4  ;;  %s3104_s27 = scalar_lea.vmem %s3103_s11, 4096  ;;  %s4286_s18 = int_to_ptr.vmem [resolvable:$true] %s2655_s18 }
 0x4fc   : > { %v2563_v52 = vadd.f32 %v2547_v3, %v2498_v12  ;;  %v2564_v57 = vadd.f32 %v2548_v0, %v2499_v30  ;;  %v2565_v41 = vadd.f32 %v2549_v6, %v2500_v17  ;;  %v2566_v7 = vadd.f32 %v2550_v61, %v2501_v15  ;;  %s3098_s12 = scalar_lea.vmem %s4286_s18, 2048  ;;  %p3105_p0 = scmp.lt.s32.totalorder %s4286_s18, %s3103_s11 }
 0x4fd   : > { %v2567_v18 = vadd.f32 %v2551_v28, %v2502_v16  ;;  %v2568_v45 = vadd.f32 %v2552_v23, %v2503_v51  ;;  %v2569_v2 = vadd.f32 %v2553_v36, %v2504_v39  ;;  %v2570_v54 = vadd.f32 %v2554_v22, %v2505_v46  ;;  %p3099_p11 = scmp.ne.s32.totalorder %s4286_s18, %s3098_s12  ;;  %p3106_p1 = scmp.lt.s32.totalorder %s3104_s27, %s3098_s12 }
 0x4fe   : > { %v4224_v56 = vadd.f32 %v2555_v24, %v2506_v58  ;;  %v4226_v5 = vadd.f32 %v2556_v42, %v2507_v31  ;;  %v4228_v43 = vadd.f32 %v2557_v19, %v2508_v47  ;;  %v4230_v33 = vadd.f32 %v2558_v40, %v2509_v4 }
 0x4ff   : > { %v4232_v8 = vadd.f32 %v2559_v29, %v2510_v35  ;;  %vm2576_vm10 = vcmp.ge.f32.partialorder %v2560_v21, 0.0  ;;  %vm2577_vm11 = vcmp.ge.f32.partialorder %v2561_v59, 0.0  ;;  %vm2578_vm12 = vcmp.ge.f32.partialorder %v2562_v14, 0.0  ;;  %p3100_p12 = pnand %p3099_p11, %p3262_p5  ;;  %p3107_p2 = por %p3106_p1, %p3105_p0 }
 0x500   : > { %vm2579_vm13 = vcmp.ge.f32.partialorder %v2563_v52, 0.0  ;;  %vm2580_vm14 = vcmp.ge.f32.partialorder %v2564_v57, 0.0  ;;  %vm2581_vm15 = vcmp.ge.f32.partialorder %v2565_v41, 0.0  ;;  %vm2582_vm1 = vcmp.ge.f32.partialorder %v2566_v7, 0.0 }
 0x501   : > { %vm2583_vm2 = vcmp.ge.f32.partialorder %v2567_v18, 0.0  ;;  %vm2584_vm5 = vcmp.ge.f32.partialorder %v2568_v45, 0.0  ;;  %vm2585_vm6 = vcmp.ge.f32.partialorder %v2569_v2, 0.0  ;;  %vm2586_vm7 = vcmp.ge.f32.partialorder %v2570_v54, 0.0  ;;  %p3101_p13 = pneg %p3100_p12 }
 0x502   : > { %vm2587_vm3 = vcmp.ge.f32.partialorder %v4224_v56, 0.0  ;;  %vm2588_vm4 = vcmp.ge.f32.partialorder %v4226_v5, 0.0  ;;  %v2592_v48 = vmul.f32 %v3097_v11, %v2560_v21  ;;  %v2593_v49 = vmul.f32 %v3097_v11, %v2561_v59 }
 0x503   : > { %v2594_v53 = vmul.f32 %v3097_v11, %v2562_v14  ;;  %v2595_v62 = vmul.f32 %v3097_v11, %v2563_v52  ;;  %v2596_v32 = vmul.f32 %v3097_v11, %v2564_v57  ;;  %v2597_v1 = vmul.f32 %v3097_v11, %v2565_v41  ;;  %p3108_p3 = pnand %p3107_p2, %p3101_p13 }
 0x504   : > { %v2598_v27 = vmul.f32 %v3097_v11, %v2566_v7  ;;  %v2599_v9 = vmul.f32 %v3097_v11, %v2567_v18  ;;  %v2600_v10 = vmul.f32 %v3097_v11, %v2568_v45  ;;  %v2601_v37 = vmul.f32 %v3097_v11, %v2569_v2 }
 0x505   : > { %v2602_v34 = vmul.f32 %v3097_v11, %v2570_v54  ;;  %v2603_v38 = vmul.f32 %v3097_v11, %v4224_v56  ;;  %v2604_v25 = vmul.f32 %v3097_v11, %v4226_v5  ;;  %v2605_v13 = vmul.f32 %v3097_v11, %v4228_v43 }
 0x506   : > { %v2606_v26 = vmul.f32 %v3097_v11, %v4230_v33  ;;  %v2607_v50 = vmul.f32 %v3097_v11, %v4232_v8  ;;  %v2608_v20 = vsel %vm2576_vm10, %v2560_v21, %v2592_v48  ;;  %v2609_v60 = vsel %vm2577_vm11, %v2561_v59, %v2593_v49  ;;  %vm4389_vm10 = vmmov %vm4386_vm0 }
 0x507   : > { %v2610_v63 = vsel %vm2578_vm12, %v2562_v14, %v2594_v53  ;;  %v2611_v55 = vsel %vm2579_vm13, %v2563_v52, %v2595_v62  ;;  %v2612_v44 = vsel %vm2580_vm14, %v2564_v57, %v2596_v32  ;;  %v2613_v12 = vsel %vm2581_vm15, %v2565_v41, %v2597_v1  ;;  %2624 = vst.msk [vmem:[%s4252_s3] sm:$0xff] %vm4386_vm0, %v2608_v20  ;;  %vm4390_vm11 = vmmov %vm4386_vm0 }
 0x508   : > { %v2614_v30 = vsel %vm2582_vm1, %v2566_v7, %v2598_v27  ;;  %2625 = vst.msk [vmem:[%s4252_s3 + $0x8] sm:$0xff] %vm4387_vm9, %v2609_v60  ;;  %v2615_v17 = vsel %vm2583_vm2, %v2567_v18, %v2599_v9  ;;  %v2616_v3 = vsel %vm2584_vm5, %v2568_v45, %v2600_v10  ;;  %v2617_v0 = vsel %vm2585_vm6, %v2569_v2, %v2601_v37  ;;  %vm4391_vm12 = vmmov %vm4386_vm0 }
 0x509   : > { %2626 = vst.msk [vmem:[%s4252_s3 + $0x10] sm:$0xff] %vm4388_vm8, %v2610_v63  ;;  %v2618_v6 = vsel %vm2586_vm7, %v2570_v54, %v2602_v34  ;;  %v2619_v61 = vsel %vm2587_vm3, %v4224_v56, %v2603_v38  ;;  %v2620_v15 = vsel %vm2588_vm4, %v4226_v5, %v2604_v25  ;;  %vm4392_vm13 = vcmp.ge.f32.partialorder %v4228_v43, 0.0  ;;  %vm4394_vm15 = vmmov %vm4386_vm0 }
 0x50a   : > { %2627 = vst.msk [vmem:[%s4252_s3 + $0x18] sm:$0xff] %vm4389_vm10, %v2611_v55  ;;  %v2621_v16 = vsel %vm4392_vm13, %v4228_v43, %v2605_v13  ;;  %vm4393_vm14 = vcmp.ge.f32.partialorder %v4230_v33, 0.0  ;;  %vm4395_vm1 = vmmov %vm4386_vm0  ;;  %vm4398_vm6 = vcmp.ge.f32.partialorder %v4232_v8, 0.0 }
 0x50b   : > { %2628 = vst.msk [vmem:[%s4252_s3 + $0x20] sm:$0xff] %vm4386_vm0, %v2612_v44  ;;  %v2622_v51 = vsel %vm4393_vm14, %v4230_v33, %v2606_v26  ;;  %vm4396_vm2 = vmmov %vm4386_vm0  ;;  %v2623_v28 = vsel %vm4398_vm6, %v4232_v8, %v2607_v50 }
 0x50c   : > { %2629 = vst.msk [vmem:[%s4252_s3 + $0x28] sm:$0xff] %vm4390_vm11, %v2613_v12  ;;  %vm4397_vm5 = vmmov %vm4386_vm0 }
 0x50d   : > { %2630 = vst.msk [vmem:[%s4252_s3 + $0x30] sm:$0xff] %vm4391_vm12, %v2614_v30  ;;  %vm4399_vm7 = vmmov %vm4386_vm0 }
 0x50e   : > { %2631 = vst.msk [vmem:[%s4252_s3 + $0x38] sm:$0xff] %vm4394_vm15, %v2615_v17  ;;  %vm4400_vm3 = vmmov %vm4386_vm0 }
 0x50f   : > { %2632 = vst.msk [vmem:[%s4252_s3 + $0x40] sm:$0xff] %vm4395_vm1, %v2616_v3  ;;  %vm4401_vm4 = vmmov %vm4386_vm0 }
 0x510   : > { %2633 = vst.msk [vmem:[%s4252_s3 + $0x48] sm:$0xff] %vm4396_vm2, %v2617_v0  ;;  %vm4402_vm8 = vmmov %vm4386_vm0 }
 0x511   : > { %2634 = vst.msk [vmem:[%s4252_s3 + $0x50] sm:$0xff] %vm4397_vm5, %v2618_v6  ;;  %vm4403_vm9 = vmmov %vm4386_vm0 }
 0x512   : > { %2635 = vst.msk [vmem:[%s4252_s3 + $0x58] sm:$0xff] %vm4399_vm7, %v2619_v61 }
 0x513   : > { %2636 = vst.msk [vmem:[%s4252_s3 + $0x60] sm:$0xff] %vm4400_vm3, %v2620_v15 }
 0x514   : > { %2637 = vst.msk [vmem:[%s4252_s3 + $0x68] sm:$0xff] %vm4401_vm4, %v2621_v16 }
 0x515   : > { %2638 = vst.msk [vmem:[%s4252_s3 + $0x70] sm:$0xff] %vm4402_vm8, %v2622_v51 }
 0x516   : > { %2639 = vst.msk [vmem:[%s4252_s3 + $0x78] sm:$0xff] %vm4403_vm9, %v2623_v28 }
 0x517   : > { %3111 = shalt.err (!%p3108_p3)
}
 0x518   : > { %s3112_s26 = scalar_lea.hbm %s4284_s21, 2048  ;;  %s3116_s3 = scalar_lea.hbm %s4373_s10, 4096 }
 0x519   : > { %p3113_p4 = scmp.ne.s32.totalorder %s4284_s21, %s3112_s26  ;;  %p3117_p9 = scmp.lt.s32.totalorder %s4284_s21, %s4373_s10 }
 0x51a   : > { %p3118_p10 = scmp.lt.s32.totalorder %s3116_s3, %s3112_s26 }
 0x51b   : > { %p3114_p7 = pnand %p3113_p4, %p3262_p5 }
 0x51c   : > { %p3119_p11 = por %p3118_p10, %p3117_p9 }
 0x51d   : > { %p3115_p8 = pneg %p3114_p7 }
 0x51f   : > { %p3120_p12 = pnand %p3119_p11, %p3115_p8 }
 0x521   : > { %3123 = shalt.err (!%p3120_p12)
}
 0x522   : > { %s3167_s12 = smov 128   ;;  %s3168_s25 = smov 8  }
 0x523   : > { %3010 = dma.vmem_to_hbm [thread:$0]  (%p3262_p5), %s4286_s18, 2048, %s4284_s21, %s4323_s30, %s3167_s12, %s3167_s12, %s3168_s25  }
 0x524 PF: > { %p3016_p13 = scmp.ge.s32.totalorder %s3158_s16, 2  ;;  %s2670_s11 = sand.u32 1, %s3146_s13  }
 0x525   : > { %s2671_s27 = scalar_lea.sflag [#allocation4], %s2670_s11 }
 0x526   : > { %p3013_p0 = pnand %p3016_p13, %p3266_p6 }
 0x528   : > { %p3014_p1 = pneg %p3013_p0 }
 0x52a   : > { %3141 = dma.done.wait (%p3014_p1), %s2671_s27, 2048  }
 0x52b   : > { %3143 = vsyncadd (%p3014_p1), %s2671_s27, 4294965248  ;;  %p20_p2 = scmp.ge.s32.totalorder %s3249_s19, 4   ;;  %s4404_s13 = smov %s3150_s14 }
 0x52c   : > { %s4405_s14 = smov %s3154_s15  ;;  %s4406_s15 = smov %s3260_s22 }
 0x52d   : > { %s4407_s16 = smov %s3249_s19  ;;  %22 = sbr.rel (!%p20_p2) target bundleno = 5 (0x5), region = 98 }
 0x532   :  { %2676 = vsyncpa [#allocation4], 1 }
 0x533   :  { %2678 = vsyncpa [#allocation4 + $0x1], 1 }

</bundles_post_ra>
